<compile_context>
chip_gen: v7x
topology: tpu7x:2x2x1
jax: 0.10.0
libtpu: 0.0.40
codegen_flags: <defaults>
</compile_context>

<pallas_src>
import functools

import jax
import jax.numpy as jnp
from jax.experimental import pallas as pl
from jax.experimental.pallas import tpu as pltpu


_PADL = 8  # sublane-aligned left/right halo width inside the padded scratch


# ----------------------------------------------------------------------------
# Pallas kernel: fused (re-parameterized) k x k conv + bias + SiLU, NHWC.
# ----------------------------------------------------------------------------
def _repvgg_fused_kernel(x_ref, w_ref, b_ref, o_ref, pad_ref, col_ref, *,
                         kernel_size, apply_act):
    # x_ref:   (1, H, W, Cin)             activation (compute dtype)
    # w_ref:   (k*k*Cin, Cout)            branch-folded weight, 2-D (compute dtype)
    # b_ref:   (1, Cout)                  branch-folded bias (f32)
    # o_ref:   (1, H*W, Cout)             output (compute/out dtype)
    # pad_ref: (H+2p, W+2*_PADL, Cin)     zero-halo scratch (compute dtype)
    # col_ref: (H*W, k*k*Cin)             im2col strip (compute dtype)
    k = kernel_size
    p = k // 2
    _, H, W, Cin = x_ref.shape
    Wp = pad_ref.shape[1]
    dt = pad_ref.dtype

    # Halo-only zeroing (the interior is fully overwritten below).  All stores
    # are 8-sublane aligned so they stay cheap/legal for packed (bf16) scratch.
    pad_ref[0:p, :, :] = jnp.zeros((p, Wp, Cin), dt)                       # top
    pad_ref[p + H:p + H + p, :, :] = jnp.zeros((p, Wp, Cin), dt)           # bottom
    pad_ref[p:p + H, 0:_PADL, :] = jnp.zeros((H, _PADL, Cin), dt)          # left
    pad_ref[p:p + H, _PADL + W:_PADL + 2 * _PADL + W - _PADL, :] = (
        jnp.zeros((H, _PADL, Cin), dt))                                    # right

    # Stage the activation into the scratch interior (already compute dtype:
    # the one and only cast happened in the wrapper).
    pad_ref[p:p + H, _PADL:_PADL + W, :] = x_ref[0]

    # Build the im2col strip: fold the k*k taps into the contraction dim.
    # Each tap is a shifted (H, W, Cin) window; (H, W, Cin) -> (H*W, Cin) is a
    # free re-labelling of the sublane tiling when W is a multiple of 8
    # (16 for bf16), which holds at typical feature-map widths.
    for ky in range(k):
        for kx in range(k):
            tap = ky * k + kx
            c0 = _PADL - p + kx
            win = pad_ref[ky:ky + H, c0:c0 + W, :]
            col_ref[:, tap * Cin:(tap + 1) * Cin] = win.reshape(H * W, Cin)

    # ONE MXU matmul, f32 accumulation inside the MXU (MRF / MRB on v7x).
    acc = jnp.dot(col_ref[...], w_ref[...], preferred_element_type=jnp.float32)

    # Fused epilogue: bias + SiLU folded into the single store expression.
    acc = acc + b_ref[...]
    if apply_act:
        acc = acc * jax.nn.sigmoid(acc)          # SiLU
    o_ref[0] = acc.astype(o_ref.dtype)


def repvgg_conv_forward(x_nchw, w_eff_hwio, bias_eff, *, act=True,
                        compute_dtype=jnp.float32, out_dtype=None):
    """Runs SiLU(conv_kxk(x, W_eff) + b_eff) with stride=1, pad=k//2 (NCHW I/O)."""
    N, Cin, H, W = x_nchw.shape
    k, k2, cin_w, Cout = w_eff_hwio.shape
    assert k == k2 and k % 2 == 1 and cin_w == Cin
    p = k // 2
    out_dtype = compute_dtype if out_dtype is None else out_dtype

    # Single cast + channel-minor (NHWC) layout for the im2col matmul.
    # TODO(synk): keep the network NHWC end-to-end to drop these transposes.
    x = jnp.transpose(x_nchw, (0, 2, 3, 1)).astype(compute_dtype)        # NHWC
    w2d = w_eff_hwio.reshape(k * k * Cin, Cout).astype(compute_dtype)    # (KKC, Cout)
    b = bias_eff.reshape(1, Cout).astype(jnp.float32)

    kernel = functools.partial(_repvgg_fused_kernel,
                               kernel_size=k, apply_act=act)

    out = pl.pallas_call(
        kernel,
        out_shape=jax.ShapeDtypeStruct((N, H * W, Cout), out_dtype),
        grid_spec=pltpu.PrefetchScalarGridSpec(
            num_scalar_prefetch=0,
            grid=(N,),
            in_specs=[
                pl.BlockSpec((1, H, W, Cin), lambda n: (n, 0, 0, 0)),
                pl.BlockSpec((k * k * Cin, Cout), lambda n: (0, 0)),
                pl.BlockSpec((1, Cout), lambda n: (0, 0)),
            ],
            out_specs=pl.BlockSpec((1, H * W, Cout), lambda n: (n, 0, 0)),
            scratch_shapes=[
                pltpu.VMEM((H + 2 * p, W + 2 * _PADL, Cin), compute_dtype),
                pltpu.VMEM((H * W, k * k * Cin), compute_dtype),
            ],
        ),
        compiler_params=pltpu.CompilerParams(
            dimension_semantics=("parallel",)),
    )(x, w2d, b)

    out = out.reshape(N, H, W, Cout)              # free metadata reshape
    return jnp.transpose(out, (0, 3, 1, 2))       # back to NCHW (module contract)


# ----------------------------------------------------------------------------
# Parameter construction + exact eval-mode branch folding (wrapper side).
# ----------------------------------------------------------------------------
def _make_bn(key, c):
    k1, k2, k3, k4 = jax.random.split(key, 4)
    gamma = 1.0 + 0.1 * jax.random.normal(k1, (c,), jnp.float32)
    beta = 0.1 * jax.random.normal(k2, (c,), jnp.float32)
    mean = 0.1 * jax.random.normal(k3, (c,), jnp.float32)
    var = jax.random.uniform(k4, (c,), jnp.float32, minval=0.5, maxval=1.5)
    return gamma, beta, mean, var


def make_params(key, cin, cout, k=3):
    """Torch-layout parameters of the module (dense kxk, 1x1, depthwise kxk)."""
    kd, k1, kdw, kbd, kb1, kbdw = jax.random.split(key, 6)
    params = dict(
        w_dense=0.1 * jax.random.normal(kd, (cout, cin, k, k), jnp.float32),
        bn_dense=_make_bn(kbd, cout),
        w_1x1=0.1 * jax.random.normal(k1, (cout, cin, 1, 1), jnp.float32),
        bn_1x1=_make_bn(kb1, cout),
        dw=None,
        k=k,
    )
    if cin == cout:   # the module only builds conv3 when in_channels == out_channels
        params["dw"] = (0.1 * jax.random.normal(kdw, (cout, 1, k, k), jnp.float32),
                        _make_bn(kbdw, cout))
    return params


def fold_branches(params, eps=1e-5):
    """Exact eval-mode RepVGG re-parameterization -> (k,k,Cin,Cout) HWIO + bias."""
    k = params["k"]

    def scale_shift(bn):
        g, b, m, v = bn
        s = g / jnp.sqrt(v + eps)
        return s, b - m * s

    s_d, t_d = scale_shift(params["bn_dense"])
    s_1, t_1 = scale_shift(params["bn_1x1"])

    w_eff = jnp.transpose(params["w_dense"], (2, 3, 1, 0)) * s_d   # (k,k,Cin,Cout)
    bias = t_d + t_1

    # 1x1 branch -> centre tap.
    w1_2d = jnp.transpose(params["w_1x1"][:, :, 0, 0], (1, 0)) * s_1   # (Cin,Cout)
    c = k // 2
    w_eff = w_eff.at[c, c].add(w1_2d)

    # Depthwise branch -> diagonal of every tap (only if cin == cout).
    if params["dw"] is not None:
        w_dw, bn_dw = params["dw"]
        s_3, t_3 = scale_shift(bn_dw)
        dw_eff = jnp.transpose(w_dw[:, 0], (1, 2, 0)) * s_3            # (k,k,Cout)
        eye = jnp.eye(w_eff.shape[2], dtype=w_eff.dtype)               # (Cin,Cout)
        w_eff = w_eff + dw_eff[:, :, None, :] * eye[None, None, :, :]
        bias = bias + t_3
    return w_eff, bias


# ----------------------------------------------------------------------------
# Plain-JAX reference matching the PyTorch forward (eval-mode BN, un-fused).
# ----------------------------------------------------------------------------
def reference_forward(x_nchw, params, eps=1e-5, act=True):
    k = params["k"]
    p = k // 2
    dn = ("NCHW", "OIHW", "NCHW")

    def bn_apply(y, bn):
        g, b, m, v = bn
        s = g / jnp.sqrt(v + eps)
        return y * s[None, :, None, None] + (b - m * s)[None, :, None, None]

    y = bn_apply(jax.lax.conv_general_dilated(
        x_nchw, params["w_dense"], (1, 1), ((p, p), (p, p)),
        dimension_numbers=dn), params["bn_dense"])
    y = y + bn_apply(jax.lax.conv_general_dilated(
        x_nchw, params["w_1x1"], (1, 1), ((0, 0), (0, 0)),
        dimension_numbers=dn), params["bn_1x1"])
    if params["dw"] is not None:
        w_dw, bn_dw = params["dw"]
        y3 = jax.lax.conv_general_dilated(
            x_nchw, w_dw, (1, 1), ((p, p), (p, p)), dimension_numbers=dn,
            feature_group_count=x_nchw.shape[1])
        y = y + bn_apply(y3, bn_dw)
    if act:
        y = y * jax.nn.sigmoid(y)
    return y


if __name__ == "__main__":
    key = jax.random.PRNGKey(0)
    k_x, k_p = jax.random.split(key)

    N, C, H, W = 2, 4, 16, 16          # in_channels == out_channels, stride 1
    x = jax.random.normal(k_x, (N, C, H, W), jnp.float32)
    params = make_params(k_p, C, C, k=3)
    w_eff, b_eff = fold_branches(params)

    ref = reference_forward(x, params)

    # f32 path: eval-mode branch folding is exact -> tight tolerance.
    out_f32 = jax.block_until_ready(
        repvgg_conv_forward(x, w_eff, b_eff, compute_dtype=jnp.float32))
    assert out_f32.shape == (N, C, H, W)
    assert jnp.allclose(out_f32, ref, rtol=1e-4, atol=1e-4), (
        f"f32 max err {jnp.max(jnp.abs(out_f32 - ref))}")

    # bf16 activations / weights / output (v6e & v7x MXU path), f32 accumulation.
    # (On v5e keep compute_dtype=f32: no bf16 VPU and little MXU gain at small K.)
    out_bf16 = jax.block_until_ready(
        repvgg_conv_forward(x, w_eff, b_eff, compute_dtype=jnp.bfloat16))
    out_bf16_f32 = out_bf16.astype(jnp.float32)
    assert jnp.allclose(out_bf16_f32, ref, rtol=5e-2, atol=6e-2), (
        f"bf16 max err {jnp.max(jnp.abs(out_bf16_f32 - ref))}")

    print("KERNEL_OK")
</pallas_src>

<mosaic_0001>
module attributes {stable_mosaic.version = 11 : i64} {
  func.func @_repvgg_fused_kernel(%arg0: i32, %arg1: memref<1x16x16x4xf32, #tpu.memory_space<vmem>>, %arg2: memref<36x4xf32, #tpu.memory_space<vmem>>, %arg3: memref<1x4xf32, #tpu.memory_space<vmem>>, %arg4: memref<1x256x4xf32, #tpu.memory_space<vmem>>, %arg5: memref<18x32x4xf32, #tpu.memory_space<vmem>>, %arg6: memref<256x36xf32, #tpu.memory_space<vmem>>) attributes {dimension_semantics = [#tpu.dimension_semantics<parallel>], iteration_bounds = array<i64: 2>, scalar_prefetch = 0 : i64, scratch_operands = 2 : i64, tpu.core_type = #tpu.core_type<tc>, window_params = [{transform_indices = @transform_0, window_bounds = array<i64: 1, 16, 16, 4>}, {pipeline_mode = #tpu.pipeline_mode<synchronous>, transform_indices = @transform_1, window_bounds = array<i64: 36, 4>}, {pipeline_mode = #tpu.pipeline_mode<synchronous>, transform_indices = @transform_2, window_bounds = array<i64: 1, 4>}, {transform_indices = @transform_3, window_bounds = array<i64: 1, 256, 4>}]} {
    %cst = arith.constant 0.000000e+00 : f32
    %0 = vector.broadcast %cst : f32 to vector<1x32x4xf32>
    %c0 = arith.constant 0 : index
    %c0_0 = arith.constant 0 : index
    %c0_1 = arith.constant 0 : index
    %1 = vector.load %arg5[%c0, %c0_0, %c0_1] : memref<18x32x4xf32, #tpu.memory_space<vmem>>, vector<1x32x4xf32>
    tpu.vector_store %arg5[%c0, %c0_0, %c0_1], %0 {strides = array<i32>} : memref<18x32x4xf32, #tpu.memory_space<vmem>>, vector<1x32x4xf32>,
    %cst_2 = arith.constant 0.000000e+00 : f32
    %2 = vector.broadcast %cst_2 : f32 to vector<1x32x4xf32>
    %c17 = arith.constant 17 : index
    %c0_3 = arith.constant 0 : index
    %c0_4 = arith.constant 0 : index
    %3 = vector.load %arg5[%c17, %c0_3, %c0_4] : memref<18x32x4xf32, #tpu.memory_space<vmem>>, vector<1x32x4xf32>
    tpu.vector_store %arg5[%c17, %c0_3, %c0_4], %2 {strides = array<i32>} : memref<18x32x4xf32, #tpu.memory_space<vmem>>, vector<1x32x4xf32>,
    %cst_5 = arith.constant 0.000000e+00 : f32
    %4 = vector.broadcast %cst_5 : f32 to vector<16x8x4xf32>
    %c1 = arith.constant 1 : index
    %c0_6 = arith.constant 0 : index
    %c0_7 = arith.constant 0 : index
    %5 = vector.load %arg5[%c1, %c0_6, %c0_7] : memref<18x32x4xf32, #tpu.memory_space<vmem>>, vector<16x8x4xf32>
    tpu.vector_store %arg5[%c1, %c0_6, %c0_7], %4 {strides = array<i32>} : memref<18x32x4xf32, #tpu.memory_space<vmem>>, vector<16x8x4xf32>,
    %cst_8 = arith.constant 0.000000e+00 : f32
    %6 = vector.broadcast %cst_8 : f32 to vector<16x8x4xf32>
    %c1_9 = arith.constant 1 : index
    %c24 = arith.constant 24 : index
    %c0_10 = arith.constant 0 : index
    %7 = vector.load %arg5[%c1_9, %c24, %c0_10] : memref<18x32x4xf32, #tpu.memory_space<vmem>>, vector<16x8x4xf32>
    tpu.vector_store %arg5[%c1_9, %c24, %c0_10], %6 {strides = array<i32>} : memref<18x32x4xf32, #tpu.memory_space<vmem>>, vector<16x8x4xf32>,
    %c0_11 = arith.constant 0 : index
    %c0_12 = arith.constant 0 : index
    %c0_13 = arith.constant 0 : index
    %c0_14 = arith.constant 0 : index
    %8 = vector.load %arg1[%c0_11, %c0_12, %c0_13, %c0_14] : memref<1x16x16x4xf32, #tpu.memory_space<vmem>>, vector<1x16x16x4xf32>
    %9 = vector.shape_cast %8 : vector<1x16x16x4xf32> to vector<16x16x4xf32>
    %c1_15 = arith.constant 1 : index
    %c8 = arith.constant 8 : index
    %c0_16 = arith.constant 0 : index
    %10 = vector.load %arg5[%c1_15, %c8, %c0_16] : memref<18x32x4xf32, #tpu.memory_space<vmem>>, vector<16x16x4xf32>
    tpu.vector_store %arg5[%c1_15, %c8, %c0_16], %9 {strides = array<i32>} : memref<18x32x4xf32, #tpu.memory_space<vmem>>, vector<16x16x4xf32>,
    %c0_17 = arith.constant 0 : index
    %c7 = arith.constant 7 : index
    %c0_18 = arith.constant 0 : index
    %11 = vector.load %arg5[%c0_17, %c7, %c0_18] : memref<18x32x4xf32, #tpu.memory_space<vmem>>, vector<16x16x4xf32>
    %12 = vector.shape_cast %11 : vector<16x16x4xf32> to vector<256x4xf32>
    %c0_19 = arith.constant 0 : index
    %c0_20 = arith.constant 0 : index
    %13 = vector.load %arg6[%c0_19, %c0_20] : memref<256x36xf32, #tpu.memory_space<vmem>>, vector<256x4xf32>
    tpu.vector_store %arg6[%c0_19, %c0_20], %12 {strides = array<i32>} : memref<256x36xf32, #tpu.memory_space<vmem>>, vector<256x4xf32>,
    %c0_21 = arith.constant 0 : index
    %c8_22 = arith.constant 8 : index
    %c0_23 = arith.constant 0 : index
    %14 = vector.load %arg5[%c0_21, %c8_22, %c0_23] : memref<18x32x4xf32, #tpu.memory_space<vmem>>, vector<16x16x4xf32>
    %15 = vector.shape_cast %14 : vector<16x16x4xf32> to vector<256x4xf32>
    %c0_24 = arith.constant 0 : index
    %c4 = arith.constant 4 : index
    %16 = vector.load %arg6[%c0_24, %c4] : memref<256x36xf32, #tpu.memory_space<vmem>>, vector<256x4xf32>
    tpu.vector_store %arg6[%c0_24, %c4], %15 {strides = array<i32>} : memref<256x36xf32, #tpu.memory_space<vmem>>, vector<256x4xf32>,
    %c0_25 = arith.constant 0 : index
    %c9 = arith.constant 9 : index
    %c0_26 = arith.constant 0 : index
    %17 = vector.load %arg5[%c0_25, %c9, %c0_26] : memref<18x32x4xf32, #tpu.memory_space<vmem>>, vector<16x16x4xf32>
    %18 = vector.shape_cast %17 : vector<16x16x4xf32> to vector<256x4xf32>
    %c0_27 = arith.constant 0 : index
    %c8_28 = arith.constant 8 : index
    %19 = vector.load %arg6[%c0_27, %c8_28] : memref<256x36xf32, #tpu.memory_space<vmem>>, vector<256x4xf32>
    tpu.vector_store %arg6[%c0_27, %c8_28], %18 {strides = array<i32>} : memref<256x36xf32, #tpu.memory_space<vmem>>, vector<256x4xf32>,
    %c1_29 = arith.constant 1 : index
    %c7_30 = arith.constant 7 : index
    %c0_31 = arith.constant 0 : index
    %20 = vector.load %arg5[%c1_29, %c7_30, %c0_31] : memref<18x32x4xf32, #tpu.memory_space<vmem>>, vector<16x16x4xf32>
    %21 = vector.shape_cast %20 : vector<16x16x4xf32> to vector<256x4xf32>
    %c0_32 = arith.constant 0 : index
    %c12 = arith.constant 12 : index
    %22 = vector.load %arg6[%c0_32, %c12] : memref<256x36xf32, #tpu.memory_space<vmem>>, vector<256x4xf32>
    tpu.vector_store %arg6[%c0_32, %c12], %21 {strides = array<i32>} : memref<256x36xf32, #tpu.memory_space<vmem>>, vector<256x4xf32>,
    %c1_33 = arith.constant 1 : index
    %c8_34 = arith.constant 8 : index
    %c0_35 = arith.constant 0 : index
    %23 = vector.load %arg5[%c1_33, %c8_34, %c0_35] : memref<18x32x4xf32, #tpu.memory_space<vmem>>, vector<16x16x4xf32>
    %24 = vector.shape_cast %23 : vector<16x16x4xf32> to vector<256x4xf32>
    %c0_36 = arith.constant 0 : index
    %c16 = arith.constant 16 : index
    %25 = vector.load %arg6[%c0_36, %c16] : memref<256x36xf32, #tpu.memory_space<vmem>>, vector<256x4xf32>
    tpu.vector_store %arg6[%c0_36, %c16], %24 {strides = array<i32>} : memref<256x36xf32, #tpu.memory_space<vmem>>, vector<256x4xf32>,
    %c1_37 = arith.constant 1 : index
    %c9_38 = arith.constant 9 : index
    %c0_39 = arith.constant 0 : index
    %26 = vector.load %arg5[%c1_37, %c9_38, %c0_39] : memref<18x32x4xf32, #tpu.memory_space<vmem>>, vector<16x16x4xf32>
    %27 = vector.shape_cast %26 : vector<16x16x4xf32> to vector<256x4xf32>
    %c0_40 = arith.constant 0 : index
    %c20 = arith.constant 20 : index
    %28 = vector.load %arg6[%c0_40, %c20] : memref<256x36xf32, #tpu.memory_space<vmem>>, vector<256x4xf32>
    tpu.vector_store %arg6[%c0_40, %c20], %27 {strides = array<i32>} : memref<256x36xf32, #tpu.memory_space<vmem>>, vector<256x4xf32>,
    %c2 = arith.constant 2 : index
    %c7_41 = arith.constant 7 : index
    %c0_42 = arith.constant 0 : index
    %29 = vector.load %arg5[%c2, %c7_41, %c0_42] : memref<18x32x4xf32, #tpu.memory_space<vmem>>, vector<16x16x4xf32>
    %30 = vector.shape_cast %29 : vector<16x16x4xf32> to vector<256x4xf32>
    %c0_43 = arith.constant 0 : index
    %c24_44 = arith.constant 24 : index
    %31 = vector.load %arg6[%c0_43, %c24_44] : memref<256x36xf32, #tpu.memory_space<vmem>>, vector<256x4xf32>
    tpu.vector_store %arg6[%c0_43, %c24_44], %30 {strides = array<i32>} : memref<256x36xf32, #tpu.memory_space<vmem>>, vector<256x4xf32>,
    %c2_45 = arith.constant 2 : index
    %c8_46 = arith.constant 8 : index
    %c0_47 = arith.constant 0 : index
    %32 = vector.load %arg5[%c2_45, %c8_46, %c0_47] : memref<18x32x4xf32, #tpu.memory_space<vmem>>, vector<16x16x4xf32>
    %33 = vector.shape_cast %32 : vector<16x16x4xf32> to vector<256x4xf32>
    %c0_48 = arith.constant 0 : index
    %c28 = arith.constant 28 : index
    %34 = vector.load %arg6[%c0_48, %c28] : memref<256x36xf32, #tpu.memory_space<vmem>>, vector<256x4xf32>
    tpu.vector_store %arg6[%c0_48, %c28], %33 {strides = array<i32>} : memref<256x36xf32, #tpu.memory_space<vmem>>, vector<256x4xf32>,
    %c2_49 = arith.constant 2 : index
    %c9_50 = arith.constant 9 : index
    %c0_51 = arith.constant 0 : index
    %35 = vector.load %arg5[%c2_49, %c9_50, %c0_51] : memref<18x32x4xf32, #tpu.memory_space<vmem>>, vector<16x16x4xf32>
    %36 = vector.shape_cast %35 : vector<16x16x4xf32> to vector<256x4xf32>
    %c0_52 = arith.constant 0 : index
    %c32 = arith.constant 32 : index
    %37 = vector.load %arg6[%c0_52, %c32] : memref<256x36xf32, #tpu.memory_space<vmem>>, vector<256x4xf32>
    tpu.vector_store %arg6[%c0_52, %c32], %36 {strides = array<i32>} : memref<256x36xf32, #tpu.memory_space<vmem>>, vector<256x4xf32>,
    %c0_53 = arith.constant 0 : index
    %c0_54 = arith.constant 0 : index
    %38 = vector.load %arg6[%c0_53, %c0_54] : memref<256x36xf32, #tpu.memory_space<vmem>>, vector<256x36xf32>
    %c0_55 = arith.constant 0 : index
    %c0_56 = arith.constant 0 : index
    %39 = vector.load %arg2[%c0_55, %c0_56] : memref<36x4xf32, #tpu.memory_space<vmem>>, vector<36x4xf32>
    %cst_57 = arith.constant dense<0.000000e+00> : vector<256x4xf32>
    %40 = tpu.matmul %38, %39, %cst_57 {dimension_numbers = #tpu.dot_dimension_numbers<[1], [0], [0], [1], [0, 0, 1, 1], [], []>} : vector<256x36xf32>, vector<36x4xf32>, vector<256x4xf32> -> vector<256x4xf32>
    %c0_58 = arith.constant 0 : index
    %c0_59 = arith.constant 0 : index
    %41 = vector.load %arg3[%c0_58, %c0_59] : memref<1x4xf32, #tpu.memory_space<vmem>>, vector<1x4xf32>
    %42 = vector.broadcast %41 : vector<1x4xf32> to vector<256x4xf32>
    %43 = arith.addf %40, %42 : vector<256x4xf32>
    %44 = arith.negf %43 : vector<256x4xf32>
    %45 = math.exp %44 : vector<256x4xf32>
    %cst_60 = arith.constant 1.000000e+00 : f32
    %46 = vector.broadcast %cst_60 : f32 to vector<256x4xf32>
    %47 = arith.addf %46, %45 : vector<256x4xf32>
    %48 = arith.divf %46, %47 : vector<256x4xf32>
    %49 = arith.mulf %43, %48 : vector<256x4xf32>
    %c0_61 = arith.constant 0 : index
    %c0_62 = arith.constant 0 : index
    %c0_63 = arith.constant 0 : index
    %50 = vector.load %arg4[%c0_61, %c0_62, %c0_63] : memref<1x256x4xf32, #tpu.memory_space<vmem>>, vector<1x256x4xf32>
    %51 = vector.shape_cast %50 : vector<1x256x4xf32> to vector<256x4xf32>
    %52 = vector.shape_cast %49 : vector<256x4xf32> to vector<1x256x4xf32>
    tpu.vector_store %arg4[%c0_61, %c0_62, %c0_63], %52 {strides = array<i32>} : memref<1x256x4xf32, #tpu.memory_space<vmem>>, vector<1x256x4xf32>,
    return
  }
  func.func @transform_0(%arg0: i32) -> (i32, i32, i32, i32) {
    %c0_i32 = arith.constant 0 : i32
    %c0_i32_0 = arith.constant 0 : i32
    %c0_i32_1 = arith.constant 0 : i32
    %c0_i32_2 = arith.constant 0 : i32
    return %arg0, %c0_i32, %c0_i32_0, %c0_i32_1 : i32, i32, i32, i32
  }
  func.func @transform_1(%arg0: i32) -> (i32, i32) {
    %c0_i32 = arith.constant 0 : i32
    %c0_i32_0 = arith.constant 0 : i32
    %c0_i32_1 = arith.constant 0 : i32
    return %c0_i32, %c0_i32_0 : i32, i32
  }
  func.func @transform_2(%arg0: i32) -> (i32, i32) {
    %c0_i32 = arith.constant 0 : i32
    %c0_i32_0 = arith.constant 0 : i32
    %c0_i32_1 = arith.constant 0 : i32
    return %c0_i32, %c0_i32_0 : i32, i32
  }
  func.func @transform_3(%arg0: i32) -> (i32, i32, i32) {
    %c0_i32 = arith.constant 0 : i32
    %c0_i32_0 = arith.constant 0 : i32
    %c0_i32_1 = arith.constant 0 : i32
    return %arg0, %c0_i32, %c0_i32_0 : i32, i32, i32
  }
}

</mosaic_0001>

<bundles_post_ra>
// kernel: tpu_custom_call.1
= control target key start
LH: loop header
LB: loop body
LE: loop exit
PB: predicated region body
PF: predicated region fallthrough
CT: control target
= control target key end

     0   :  { %s2938_s12 = smov 0   ;;  %s4047_s0 = inlined_call_operand.vmem [shape: f32[2,16,16,4], index: 0, kind: input, shape index: {}]   ;;  %s4048_s1 = inlined_call_operand.vmem [shape: f32[36,4], index: 1, kind: input, shape index: {}]   ;;  %s4049_s2 = inlined_call_operand.vmem [shape: f32[1,4], index: 2, kind: input, shape index: {}]   ;;  %s4050_s3 = inlined_call_operand.vmem [shape: f32[2,256,4], index: 3, kind: output, shape index: {}]  }
   0x1 LB: > { %s2568_s13 = sadd.s32 4294967295, %s2907_s12   ;;  %p2572_p0 = scmp.ge.s32.totalorder %s2907_s12, 1  ;;  %s2907_s12 = sphi %s2938_s12, %s13_s12  }
   0x2   : > { %p137_p1 = scmp.lt.s32.totalorder %s2907_s12, 3 }
   0x4   : > { %p138_p2 = pnand %p2572_p0, %p137_p1 }
   0x6   : > { %141 = sbr.rel (%p138_p2) target bundleno = 917 (0x395), region = 32 }
   0xd   : > { %vm171_vm0 = vcmask 31744   ;;  %p2948_p3 = scmp.lt.s32.totalorder %s2568_s13, 1  ;;  %v2909_v0 = vmov 0.0   ;;  %s2910_s19 = smov 4   ;;  %vm502_vm1 = vcmask 64544   ;;  %vm695_vm2 = vcmask 97344  }
   0xe   : > { %173 = vst.msk [vmem:[#allocation2 + $0x8] sm:$0xff] %vm171_vm0, %v2909_v0  ;;  %172 = vst.msk [vmem:[#allocation2] sm:$0xff] %vm171_vm0, %v2909_v0  ;;  %s2911_s20 = smov 8   ;;  %s2912_s21 = smov 12   ;;  %vm2028_vm3 = vcmask 1043456   ;;  %vm888_vm4 = vcmask 130144  }
   0xf   : > { %174 = vst.msk [vmem:[#allocation2 + $0x10] sm:$0xff] %vm171_vm0, %v2909_v0  ;;  %175 = vst.msk [vmem:[#allocation2 + $0x18] sm:$0xff] %vm171_vm0, %v2909_v0  ;;  %s4068_s13 = smov (!%p2948_p3, %s2568_s13), 1  ;;  %s2913_s22 = smov 16   ;;  %vm1081_vm5 = vcmask 162944   ;;  %vm1274_vm6 = vcmask 195744  }
  0x10   : > { %177 = vst.msk [vmem:[#allocation2 + $0x220] sm:$0xff] %vm171_vm0, %v2909_v0  ;;  %178 = vst.msk [vmem:[#allocation2 + $0x228] sm:$0xff] %vm171_vm0, %v2909_v0  ;;  %s2645_s15 = sshll.u32 %s4068_s13, 8  ;;  %s2914_s23 = smov 20   ;;  %vm1468_vm7 = vcmask 228544   ;;  %vm1661_vm8 = vcmask 261344  }
  0x11   : > { %179 = vst.msk [vmem:[#allocation2 + $0x230] sm:$0xff] %vm171_vm0, %v2909_v0  ;;  %180 = vst.msk [vmem:[#allocation2 + $0x238] sm:$0xff] %vm171_vm0, %v2909_v0  ;;  %s3004_s18 = scalar_lea.vmem %s4047_s0, %s2645_s15  ;;  %s2915_s24 = smov 24   ;;  %vm1854_vm9 = vcmask 294144   ;;  %vm1931_vm10 = vcmask 293888  }
  0x12   : > { %182 = vst.msk [vmem:[#allocation2 + $0x20] sm:$0xff] %vm171_vm0, %v2909_v0  ;;  %183 = vst.msk [vmem:[#allocation2 + $0x40] sm:$0xff] %vm171_vm0, %v2909_v0  ;;  %v214_v1 = vld [vmem:[%s3004_s18] sm:$0xff]  ;;  %v216_v2 = vld [vmem:[%s3004_s18 + $0x10] sm:$0xff]  ;;  %s2916_s25 = smov 28   ;;  %s2917_s7 = smov 32  }
  0x13   : > { %184 = vst.msk [vmem:[#allocation2 + $0x60] sm:$0xff] %vm171_vm0, %v2909_v0  ;;  %185 = vst.msk [vmem:[#allocation2 + $0x80] sm:$0xff] %vm171_vm0, %v2909_v0  ;;  %v215_v3 = vld [vmem:[%s3004_s18 + $0x8] sm:$0xff]  ;;  %v218_v4 = vld [vmem:[%s3004_s18 + $0x20] sm:$0xff]  ;;  %s3919_s17 = scalar_lea.vmem %s4050_s3, %s2645_s15 }
  0x14   : > { %186 = vst.msk [vmem:[#allocation2 + $0xa0] sm:$0xff] %vm171_vm0, %v2909_v0  ;;  %187 = vst.msk [vmem:[#allocation2 + $0xc0] sm:$0xff] %vm171_vm0, %v2909_v0  ;;  %v217_v5 = vld [vmem:[%s3004_s18 + $0x18] sm:$0xff]  ;;  %v220_v6 = vld [vmem:[%s3004_s18 + $0x30] sm:$0xff] }
  0x15   : > { %188 = vst.msk [vmem:[#allocation2 + $0xe0] sm:$0xff] %vm171_vm0, %v2909_v0  ;;  %189 = vst.msk [vmem:[#allocation2 + $0x100] sm:$0xff] %vm171_vm0, %v2909_v0  ;;  %v342_v7 = vld [vmem:[#allocation2 + $0x8] sm:$0xff]  ;;  %v222_v10 = vld [vmem:[%s3004_s18 + $0x40] sm:$0xff] }
  0x16   : > { %190 = vst.msk [vmem:[#allocation2 + $0x120] sm:$0xff] %vm171_vm0, %v2909_v0  ;;  %191 = vst.msk [vmem:[#allocation2 + $0x140] sm:$0xff] %vm171_vm0, %v2909_v0  ;;  %v343_v8 = vld [vmem:[#allocation2 + $0x10] sm:$0xff]  ;;  %v219_v9 = vld [vmem:[%s3004_s18 + $0x28] sm:$0xff]  ;;  %406 = vrot.lane.b32.xlu0 %v342_v7, %s2910_s19 }
  0x17   : > { %192 = vst.msk [vmem:[#allocation2 + $0x160] sm:$0xff] %vm171_vm0, %v2909_v0  ;;  %193 = vst.msk [vmem:[#allocation2 + $0x180] sm:$0xff] %vm171_vm0, %v2909_v0  ;;  %v221_v11 = vld [vmem:[%s3004_s18 + $0x38] sm:$0xff]  ;;  %v224_v12 = vld [vmem:[%s3004_s18 + $0x50] sm:$0xff] }
  0x18   : > { %194 = vst.msk [vmem:[#allocation2 + $0x1a0] sm:$0xff] %vm171_vm0, %v2909_v0  ;;  %195 = vst.msk [vmem:[#allocation2 + $0x1c0] sm:$0xff] %vm171_vm0, %v2909_v0  ;;  %v223_v13 = vld [vmem:[%s3004_s18 + $0x48] sm:$0xff]  ;;  %v226_v14 = vld [vmem:[%s3004_s18 + $0x60] sm:$0xff] }
  0x19   : > { %196 = vst.msk [vmem:[#allocation2 + $0x1e0] sm:$0xff] %vm171_vm0, %v2909_v0  ;;  %197 = vst.msk [vmem:[#allocation2 + $0x200] sm:$0xff] %vm171_vm0, %v2909_v0  ;;  %v225_v15 = vld [vmem:[%s3004_s18 + $0x58] sm:$0xff]  ;;  %v228_v16 = vld [vmem:[%s3004_s18 + $0x70] sm:$0xff] }
  0x1a   : > { %198 = vst.msk [vmem:[#allocation2 + $0x38] sm:$0xff] %vm171_vm0, %v2909_v0  ;;  %199 = vst.msk [vmem:[#allocation2 + $0x58] sm:$0xff] %vm171_vm0, %v2909_v0  ;;  %v227_v17 = vld [vmem:[%s3004_s18 + $0x68] sm:$0xff]  ;;  %v230_v18 = vld [vmem:[%s3004_s18 + $0x80] sm:$0xff]  ;;  %408 = vrot.lane.b32.xlu0 %v343_v8, %s2910_s19 }
  0x1b   : > { %200 = vst.msk [vmem:[#allocation2 + $0x78] sm:$0xff] %vm171_vm0, %v2909_v0  ;;  %201 = vst.msk [vmem:[#allocation2 + $0x98] sm:$0xff] %vm171_vm0, %v2909_v0  ;;  %v229_v19 = vld [vmem:[%s3004_s18 + $0x78] sm:$0xff]  ;;  %v232_v20 = vld [vmem:[%s3004_s18 + $0x90] sm:$0xff] }
  0x1c   : > { %202 = vst.msk [vmem:[#allocation2 + $0xb8] sm:$0xff] %vm171_vm0, %v2909_v0  ;;  %203 = vst.msk [vmem:[#allocation2 + $0xd8] sm:$0xff] %vm171_vm0, %v2909_v0  ;;  %v231_v21 = vld [vmem:[%s3004_s18 + $0x88] sm:$0xff]  ;;  %v234_v22 = vld [vmem:[%s3004_s18 + $0xa0] sm:$0xff] }
  0x1d   : > { %204 = vst.msk [vmem:[#allocation2 + $0xf8] sm:$0xff] %vm171_vm0, %v2909_v0  ;;  %205 = vst.msk [vmem:[#allocation2 + $0x118] sm:$0xff] %vm171_vm0, %v2909_v0  ;;  %v233_v23 = vld [vmem:[%s3004_s18 + $0x98] sm:$0xff]  ;;  %v236_v24 = vld [vmem:[%s3004_s18 + $0xb0] sm:$0xff] }
  0x1e   : > { %206 = vst.msk [vmem:[#allocation2 + $0x138] sm:$0xff] %vm171_vm0, %v2909_v0  ;;  %207 = vst.msk [vmem:[#allocation2 + $0x158] sm:$0xff] %vm171_vm0, %v2909_v0  ;;  %v235_v28 = vld [vmem:[%s3004_s18 + $0xa8] sm:$0xff]  ;;  %v238_v29 = vld [vmem:[%s3004_s18 + $0xc0] sm:$0xff] }
  0x1f   : > { %208 = vst.msk [vmem:[#allocation2 + $0x178] sm:$0xff] %vm171_vm0, %v2909_v0  ;;  %209 = vst.msk [vmem:[#allocation2 + $0x198] sm:$0xff] %vm171_vm0, %v2909_v0  ;;  %v237_v33 = vld [vmem:[%s3004_s18 + $0xb8] sm:$0xff]  ;;  %v240_v34 = vld [vmem:[%s3004_s18 + $0xd0] sm:$0xff] }
  0x20   : > { %210 = vst.msk [vmem:[#allocation2 + $0x1b8] sm:$0xff] %vm171_vm0, %v2909_v0  ;;  %211 = vst.msk [vmem:[#allocation2 + $0x1d8] sm:$0xff] %vm171_vm0, %v2909_v0  ;;  %v239_v35 = vld [vmem:[%s3004_s18 + $0xc8] sm:$0xff]  ;;  %v242_v36 = vld [vmem:[%s3004_s18 + $0xe0] sm:$0xff] }
  0x21   : > { %212 = vst.msk [vmem:[#allocation2 + $0x1f8] sm:$0xff] %vm171_vm0, %v2909_v0  ;;  %213 = vst.msk [vmem:[#allocation2 + $0x218] sm:$0xff] %vm171_vm0, %v2909_v0  ;;  %v241_v37 = vld [vmem:[%s3004_s18 + $0xd8] sm:$0xff]  ;;  %v243_v39 = vld [vmem:[%s3004_s18 + $0xe8] sm:$0xff] }
  0x22   : > { %246 = vst.msk [vmem:[#allocation2 + $0x28] sm:$0xff] %vm171_vm0, %v214_v1  ;;  %248 = vst.msk [vmem:[#allocation2 + $0x48] sm:$0xff] %vm171_vm0, %v216_v2  ;;  %v278_v45 = vld [vmem:[#allocation2 + $0x7] sm:$0xff]  ;;  %v279_v46 = vld [vmem:[#allocation2 + $0xf] sm:$0xff] }
  0x23   : > { %247 = vst.msk [vmem:[#allocation2 + $0x30] sm:$0xff] %vm171_vm0, %v215_v3  ;;  %250 = vst.msk [vmem:[#allocation2 + $0x68] sm:$0xff] %vm171_vm0, %v218_v4 }
  0x24   : > { %249 = vst.msk [vmem:[#allocation2 + $0x50] sm:$0xff] %vm171_vm0, %v217_v5  ;;  %252 = vst.msk [vmem:[#allocation2 + $0x88] sm:$0xff] %vm171_vm0, %v220_v6 }
  0x25   : > { %251 = vst.msk [vmem:[#allocation2 + $0x70] sm:$0xff] %vm171_vm0, %v219_v9  ;;  %254 = vst.msk [vmem:[#allocation2 + $0xa8] sm:$0xff] %vm171_vm0, %v222_v10 }
  0x26   : > { %253 = vst.msk [vmem:[#allocation2 + $0x90] sm:$0xff] %vm171_vm0, %v221_v11  ;;  %256 = vst.msk [vmem:[#allocation2 + $0xc8] sm:$0xff] %vm171_vm0, %v224_v12 }
  0x27   : > { %255 = vst.msk [vmem:[#allocation2 + $0xb0] sm:$0xff] %vm171_vm0, %v223_v13  ;;  %258 = vst.msk [vmem:[#allocation2 + $0xe8] sm:$0xff] %vm171_vm0, %v226_v14 }
  0x28   : > { %257 = vst.msk [vmem:[#allocation2 + $0xd0] sm:$0xff] %vm171_vm0, %v225_v15  ;;  %260 = vst.msk [vmem:[#allocation2 + $0x108] sm:$0xff] %vm171_vm0, %v228_v16 }
  0x29   : > { %259 = vst.msk [vmem:[#allocation2 + $0xf0] sm:$0xff] %vm171_vm0, %v227_v17  ;;  %262 = vst.msk [vmem:[#allocation2 + $0x128] sm:$0xff] %vm171_vm0, %v230_v18  ;;  %v3049_v25 = vld [vmem:[#allocation2 + $0x28] sm:$0xff] }
  0x2a   : > { %261 = vst.msk [vmem:[#allocation2 + $0x110] sm:$0xff] %vm171_vm0, %v229_v19  ;;  %264 = vst.msk [vmem:[#allocation2 + $0x148] sm:$0xff] %vm171_vm0, %v232_v20  ;;  %v3051_v26 = vld [vmem:[#allocation2 + $0x48] sm:$0xff]  ;;  %410 = vrot.lane.b32.xlu1 %v3049_v25, %s2910_s19  ;;  %v3058_v27 = vld [vmem:[#allocation2 + $0x30] sm:$0xff] }
  0x2b   : > { %263 = vst.msk [vmem:[#allocation2 + $0x130] sm:$0xff] %vm171_vm0, %v231_v21  ;;  %266 = vst.msk [vmem:[#allocation2 + $0x168] sm:$0xff] %vm171_vm0, %v234_v22  ;;  %414 = vrot.lane.b32.xlu0 %v3051_v26, %s2910_s19  ;;  %v3066_v30 = vld [vmem:[#allocation2 + $0x68] sm:$0xff]  ;;  %v3070_v31 = vld [vmem:[#allocation2 + $0x50] sm:$0xff] }
  0x2c   : > { %265 = vst.msk [vmem:[#allocation2 + $0x150] sm:$0xff] %vm171_vm0, %v233_v23  ;;  %268 = vst.msk [vmem:[#allocation2 + $0x188] sm:$0xff] %vm171_vm0, %v236_v24  ;;  %v350_v32 = vld [vmem:[#allocation2 + $0x88] sm:$0xff]  ;;  %v3084_v38 = vld [vmem:[#allocation2 + $0x70] sm:$0xff] }
  0x2d   : > { %267 = vst.msk [vmem:[#allocation2 + $0x170] sm:$0xff] %vm171_vm0, %v235_v28  ;;  %270 = vst.msk [vmem:[#allocation2 + $0x1a8] sm:$0xff] %vm171_vm0, %v238_v29  ;;  %v352_v40 = vld [vmem:[#allocation2 + $0xa8] sm:$0xff]  ;;  %v351_v41 = vld [vmem:[#allocation2 + $0x90] sm:$0xff] }
  0x2e   : > { %412 = vrot.lane.b32.xlu1 %v3058_v27, %s2910_s19  ;;  %269 = vst.msk [vmem:[#allocation2 + $0x190] sm:$0xff] %vm171_vm0, %v237_v33  ;;  %272 = vst.msk [vmem:[#allocation2 + $0x1c8] sm:$0xff] %vm171_vm0, %v240_v34  ;;  %v354_v42 = vld [vmem:[#allocation2 + $0xc8] sm:$0xff]  ;;  %v353_v43 = vld [vmem:[#allocation2 + $0xb0] sm:$0xff] }
  0x2f   : > { %418 = vrot.lane.b32.xlu0 %v3066_v30, %s2910_s19  ;;  %271 = vst.msk [vmem:[#allocation2 + $0x1b0] sm:$0xff] %vm171_vm0, %v239_v35  ;;  %274 = vst.msk [vmem:[#allocation2 + $0x1e8] sm:$0xff] %vm171_vm0, %v242_v36  ;;  %v356_v44 = vld [vmem:[#allocation2 + $0xe8] sm:$0xff]  ;;  %v355_v47 = vld [vmem:[#allocation2 + $0xd0] sm:$0xff] }
  0x30   : > { %273 = vst.msk [vmem:[#allocation2 + $0x1d0] sm:$0xff] %vm171_vm0, %v241_v37  ;;  %275 = vst.msk [vmem:[#allocation2 + $0x1f0] sm:$0xff] %vm171_vm0, %v243_v39  ;;  %v3099_v48 = vld [vmem:[#allocation2 + $0x27] sm:$0xff]  ;;  %v3108_v51 = vld [vmem:[#allocation2 + $0x2f] sm:$0xff] }
  0x31   : > { %310 = vst.msk [vmem:[#allocation3] sm:$0xff] %vm171_vm0, %v278_v45  ;;  %311 = vst.msk [vmem:[#allocation3 + $0x8] sm:$0xff] %vm171_vm0, %v279_v46  ;;  %v3104_v49 = vld [vmem:[#allocation2 + $0x47] sm:$0xff]  ;;  %v357_v53 = vld [vmem:[#allocation2 + $0xf0] sm:$0xff] }
  0x32   : > { %416 = vrot.lane.b32.xlu1 %v3070_v31, %s2910_s19  ;;  %312 = vst.msk [vmem:[#allocation3 + $0x10] sm:$0xff] %vm171_vm0, %v3099_v48  ;;  %v358_v50 = vld [vmem:[#allocation2 + $0x108] sm:$0xff]  ;;  %314 = vst.msk [vmem:[#allocation3 + $0x20] sm:$0xff] %vm171_vm0, %v3104_v49  ;;  %v359_v63 = vld [vmem:[#allocation2 + $0x110] sm:$0xff] }
  0x33   : > { %422 = vrot.lane.b32.xlu0 %v350_v32, %s2910_s19  ;;  %v3110_v52 = vld [vmem:[#allocation2 + $0x67] sm:$0xff]  ;;  %313 = vst.msk [vmem:[#allocation3 + $0x18] sm:$0xff] %vm171_vm0, %v3108_v51  ;;  %v3117_v54 = vld [vmem:[#allocation2 + $0x4f] sm:$0xff] }
  0x34   : > { %316 = vst.msk [vmem:[#allocation3 + $0x30] sm:$0xff] %vm171_vm0, %v3110_v52  ;;  %v3119_v55 = vld [vmem:[#allocation2 + $0x87] sm:$0xff]  ;;  %315 = vst.msk [vmem:[#allocation3 + $0x28] sm:$0xff] %vm171_vm0, %v3117_v54  ;;  %v3127_v57 = vld [vmem:[#allocation2 + $0x6f] sm:$0xff] }
  0x35   : > { %v3121_v56 = vld [vmem:[#allocation2 + $0x128] sm:$0xff]  ;;  %318 = vst.msk [vmem:[#allocation3 + $0x40] sm:$0xff] %vm171_vm0, %v3119_v55  ;;  %317 = vst.msk [vmem:[#allocation3 + $0x38] sm:$0xff] %vm171_vm0, %v3127_v57  ;;  %v3206_v13 = vld [vmem:[#allocation2 + $0x130] sm:$0xff] }
  0x36   : > { %420 = vrot.lane.b32.xlu1 %v3084_v38, %s2910_s19  ;;  %v3129_v58 = vld [vmem:[#allocation2 + $0xa7] sm:$0xff]  ;;  %v3131_v59 = vld [vmem:[#allocation2 + $0x8f] sm:$0xff] }
  0x37   : > { %426 = vrot.lane.b32.xlu0 %v352_v40, %s2910_s19  ;;  %320 = vst.msk [vmem:[#allocation3 + $0x50] sm:$0xff] %vm171_vm0, %v3129_v58  ;;  %319 = vst.msk [vmem:[#allocation3 + $0x48] sm:$0xff] %vm171_vm0, %v3131_v59  ;;  %v3140_v60 = vld [vmem:[#allocation2 + $0xc7] sm:$0xff]  ;;  %v3142_v61 = vld [vmem:[#allocation2 + $0xaf] sm:$0xff] }
  0x38   : > { %v3144_v62 = vld [vmem:[#allocation2 + $0xe7] sm:$0xff]  ;;  %322 = vst.msk [vmem:[#allocation3 + $0x60] sm:$0xff] %vm171_vm0, %v3140_v60  ;;  %321 = vst.msk [vmem:[#allocation3 + $0x58] sm:$0xff] %vm171_vm0, %v3142_v61  ;;  %v3152_v0 = vld [vmem:[#allocation2 + $0xcf] sm:$0xff] }
  0x39   : > { %324 = vst.msk [vmem:[#allocation3 + $0x70] sm:$0xff] %vm171_vm0, %v3144_v62  ;;  %v3154_v1 = vld [vmem:[#allocation2 + $0x107] sm:$0xff]  ;;  %v3156_v2 = vld [vmem:[#allocation2 + $0xef] sm:$0xff]  ;;  %323 = vst.msk [vmem:[#allocation3 + $0x68] sm:$0xff] %vm171_vm0, %v3152_v0 }
  0x3a   : > { %424 = vrot.lane.b32.xlu1 %v351_v41, %s2910_s19  ;;  %326 = vst.msk [vmem:[#allocation3 + $0x80] sm:$0xff] %vm171_vm0, %v3154_v1  ;;  %325 = vst.msk [vmem:[#allocation3 + $0x78] sm:$0xff] %vm171_vm0, %v3156_v2  ;;  %v3165_v3 = vld [vmem:[#allocation2 + $0x127] sm:$0xff]  ;;  %v3167_v4 = vld [vmem:[#allocation2 + $0x10f] sm:$0xff] }
  0x3b   : > { %430 = vrot.lane.b32.xlu0 %v354_v42, %s2910_s19  ;;  %v3169_v5 = vld [vmem:[#allocation2 + $0x147] sm:$0xff]  ;;  %328 = vst.msk [vmem:[#allocation3 + $0x90] sm:$0xff] %vm171_vm0, %v3165_v3  ;;  %327 = vst.msk [vmem:[#allocation3 + $0x88] sm:$0xff] %vm171_vm0, %v3167_v4  ;;  %v3177_v6 = vld [vmem:[#allocation2 + $0x12f] sm:$0xff] }
  0x3c   : > { %330 = vst.msk [vmem:[#allocation3 + $0xa0] sm:$0xff] %vm171_vm0, %v3169_v5  ;;  %v3179_v7 = vld [vmem:[#allocation2 + $0x167] sm:$0xff]  ;;  %v3181_v8 = vld [vmem:[#allocation2 + $0x14f] sm:$0xff]  ;;  %329 = vst.msk [vmem:[#allocation3 + $0x98] sm:$0xff] %vm171_vm0, %v3177_v6 }
  0x3d   : > { %332 = vst.msk [vmem:[#allocation3 + $0xb0] sm:$0xff] %vm171_vm0, %v3179_v7  ;;  %331 = vst.msk [vmem:[#allocation3 + $0xa8] sm:$0xff] %vm171_vm0, %v3181_v8  ;;  %v3191_v9 = vld [vmem:[#allocation2 + $0x187] sm:$0xff]  ;;  %v3193_v10 = vld [vmem:[#allocation2 + $0x16f] sm:$0xff] }
  0x3e   : > { %428 = vrot.lane.b32.xlu1 %v353_v43, %s2910_s19  ;;  %v3195_v11 = vld [vmem:[#allocation2 + $0x148] sm:$0xff]  ;;  %334 = vst.msk [vmem:[#allocation3 + $0xc0] sm:$0xff] %vm171_vm0, %v3191_v9  ;;  %333 = vst.msk [vmem:[#allocation3 + $0xb8] sm:$0xff] %vm171_vm0, %v3193_v10  ;;  %v3222_v17 = vld [vmem:[#allocation2 + $0x150] sm:$0xff] }
  0x3f   : > { %434 = vrot.lane.b32.xlu0 %v356_v44, %s2910_s19  ;;  %v3201_v12 = vld [vmem:[#allocation2 + $0x1a7] sm:$0xff]  ;;  %v3208_v14 = vld [vmem:[#allocation2 + $0x18f] sm:$0xff] }
  0x40   : > { %336 = vst.msk [vmem:[#allocation3 + $0xd0] sm:$0xff] %vm171_vm0, %v3201_v12  ;;  %335 = vst.msk [vmem:[#allocation3 + $0xc8] sm:$0xff] %vm171_vm0, %v3208_v14  ;;  %v3214_v15 = vld [vmem:[#allocation2 + $0x168] sm:$0xff]  ;;  %v3235_v21 = vld [vmem:[#allocation2 + $0x170] sm:$0xff] }
  0x41   : > { %v3216_v16 = vld [vmem:[#allocation2 + $0x1c7] sm:$0xff]  ;;  %v3224_v18 = vld [vmem:[#allocation2 + $0x1af] sm:$0xff] }
  0x42   : > { %432 = vrot.lane.b32.xlu1 %v355_v47, %s2910_s19  ;;  %4059 = vst [vmem:[#allocation4_spill] sm:$0xff] %v3216_v16  ;;  %338 = vst.msk [vmem:[#allocation3 + $0xe0] sm:$0xff] %vm171_vm0, %v3216_v16  ;;  %v3230_v19 = vld [vmem:[#allocation2 + $0x188] sm:$0xff]  ;;  %v3245_v24 = vld [vmem:[#allocation2 + $0x190] sm:$0xff] }
  0x43   : > { %438 = vrot.lane.b32.xlu0 %v358_v50, %s2910_s19  ;;  %4060 = vst [vmem:[#allocation5_spill] sm:$0xff] %v3224_v18  ;;  %337 = vst.msk [vmem:[#allocation3 + $0xd8] sm:$0xff] %vm171_vm0, %v3224_v18  ;;  %v308_v20 = vld [vmem:[#allocation2 + $0x1e7] sm:$0xff]  ;;  %v3237_v22 = vld [vmem:[#allocation2 + $0x1cf] sm:$0xff] }
  0x44   : > { %340 = vst.msk [vmem:[#allocation3 + $0xf0] sm:$0xff] %vm171_vm0, %v308_v20  ;;  %4061 = vst [vmem:[#allocation6_spill] sm:$0xff] %v3237_v22  ;;  %v368_v23 = vld [vmem:[#allocation2 + $0x1a8] sm:$0xff]  ;;  %v369_v32 = vld [vmem:[#allocation2 + $0x1b0] sm:$0xff] }
  0x45   : > { %339 = vst.msk [vmem:[#allocation3 + $0xe8] sm:$0xff] %vm171_vm0, %v3237_v22  ;;  %v3247_v28 = vld [vmem:[#allocation2 + $0x1ef] sm:$0xff] }
  0x46   : > { %436 = vrot.lane.b32.xlu1 %v357_v53, %s2910_s19  ;;  %4062 = vst [vmem:[#allocation7_spill] sm:$0xff] %v3247_v28  ;;  %341 = vst.msk [vmem:[#allocation3 + $0xf8] sm:$0xff] %vm171_vm0, %v3247_v28  ;;  %v370_v29 = vld [vmem:[#allocation2 + $0x1c8] sm:$0xff]  ;;  %v371_v34 = vld [vmem:[#allocation2 + $0x1d0] sm:$0xff] }
  0x47   : > { %442 = vrot.lane.b32.xlu0 %v3121_v56, %s2910_s19  ;;  %v372_v33 = vld [vmem:[#allocation2 + $0x1e8] sm:$0xff]  ;;  %v373_v36 = vld [vmem:[#allocation2 + $0x1f0] sm:$0xff] }
  0x48   : > { %v535_v35 = vld [vmem:[#allocation2 + $0x9] sm:$0xff]  ;;  %v536_v39 = vld [vmem:[#allocation2 + $0x11] sm:$0xff] }
  0x49   : > { %v3259_v37 = vld [vmem:[#allocation2 + $0x29] sm:$0xff]  ;;  %v3267_v41 = vld [vmem:[#allocation2 + $0x31] sm:$0xff] }
  0x4a   : > { %440 = vrot.lane.b32.xlu1 %v359_v63, %s2910_s19  ;;  %v3264_v40 = vld [vmem:[#allocation2 + $0x49] sm:$0xff]  ;;  %v3275_v43 = vld [vmem:[#allocation2 + $0x51] sm:$0xff] }
  0x4b   : > { %446 = vrot.lane.b32.xlu0 %v3195_v11, %s2910_s19  ;;  %v3271_v42 = vld [vmem:[#allocation2 + $0x69] sm:$0xff]  ;;  %v3283_v45 = vld [vmem:[#allocation2 + $0x71] sm:$0xff] }
  0x4c   : > { %v3279_v44 = vld [vmem:[#allocation2 + $0x89] sm:$0xff]  ;;  %v3289_v47 = vld [vmem:[#allocation2 + $0x91] sm:$0xff] }
  0x4d   : > { %v545_v46 = vld [vmem:[#allocation2 + $0xa9] sm:$0xff]  ;;  %v546_v53 = vld [vmem:[#allocation2 + $0xb1] sm:$0xff] }
  0x4e   : > { %444 = vrot.lane.b32.xlu1 %v3206_v13, %s2910_s19  ;;  %v547_v50 = vld [vmem:[#allocation2 + $0xc9] sm:$0xff]  ;;  %v548_v20 = vld [vmem:[#allocation2 + $0xd1] sm:$0xff] }
  0x4f   : > { %450 = vrot.lane.b32.xlu0 %v3214_v15, %s2910_s19  ;;  %v549_v63 = vld [vmem:[#allocation2 + $0xe9] sm:$0xff] }
  0x50   : > { %v565_v22 = vld [vmem:[#allocation2 + $0x1e9] sm:$0xff] }
  0x52   : > { %448 = vrot.lane.b32.xlu1 %v3222_v17, %s2910_s19 }
  0x53   : > { %454 = vrot.lane.b32.xlu0 %v3230_v19, %s2910_s19 }
  0x56   : > { %452 = vrot.lane.b32.xlu1 %v3235_v21, %s2910_s19 }
  0x57   : > { %458 = vrot.lane.b32.xlu0 %v368_v23, %s2910_s19  ;;  %v551_v23 = vld [vmem:[#allocation2 + $0x109] sm:$0xff] }
  0x5a   : > { %456 = vrot.lane.b32.xlu1 %v3245_v24, %s2910_s19 }
  0x5b   : > { %462 = vrot.lane.b32.xlu0 %v370_v29, %s2910_s19  ;;  %v550_v29 = vld [vmem:[#allocation2 + $0xf1] sm:$0xff] }
  0x5e   : > { %460 = vrot.lane.b32.xlu1 %v369_v32, %s2910_s19  ;;  %v3299_v32 = vld [vmem:[#allocation2 + $0x129] sm:$0xff] }
  0x5f   : > { %466 = vrot.lane.b32.xlu0 %v372_v33, %s2910_s19  ;;  %v552_v33 = vld [vmem:[#allocation2 + $0x111] sm:$0xff] }
  0x62   : > { %464 = vrot.lane.b32.xlu1 %v371_v34, %s2910_s19  ;;  %v3304_v34 = vld [vmem:[#allocation2 + $0x149] sm:$0xff] }
  0x63   : > { %599 = vrot.lane.b32.xlu0 %v535_v35, %s2911_s20  ;;  %v3307_v35 = vld [vmem:[#allocation2 + $0x131] sm:$0xff] }
  0x66   : > { %468 = vrot.lane.b32.xlu1 %v373_v36, %s2910_s19  ;;  %v3311_v36 = vld [vmem:[#allocation2 + $0x169] sm:$0xff] }
  0x67   : > { %603 = vrot.lane.b32.xlu0 %v3259_v37, %s2911_s20 }
  0x6a   : > { %601 = vrot.lane.b32.xlu1 %v536_v39, %s2911_s20  ;;  %v3315_v39 = vld [vmem:[#allocation2 + $0x151] sm:$0xff] }
  0x6b   : > { %607 = vrot.lane.b32.xlu0 %v3264_v40, %s2911_s20 }
  0x6e   : > { %605 = vrot.lane.b32.xlu1 %v3267_v41, %s2911_s20 }
  0x6f   : > { %611 = vrot.lane.b32.xlu0 %v3271_v42, %s2911_s20 }
  0x72   : > { %609 = vrot.lane.b32.xlu1 %v3275_v43, %s2911_s20 }
  0x73   : > { %615 = vrot.lane.b32.xlu0 %v3279_v44, %s2911_s20 }
  0x76   : > { %613 = vrot.lane.b32.xlu1 %v3283_v45, %s2911_s20 }
  0x77   : > { %619 = vrot.lane.b32.xlu0 %v545_v46, %s2911_s20  ;;  %v3319_v46 = vld [vmem:[#allocation2 + $0x189] sm:$0xff] }
  0x7a   : > { %617 = vrot.lane.b32.xlu1 %v3289_v47, %s2911_s20 }
  0x7b   : > { %623 = vrot.lane.b32.xlu0 %v547_v50, %s2911_s20  ;;  %v3323_v50 = vld [vmem:[#allocation2 + $0x171] sm:$0xff] }
  0x7e   : > { %621 = vrot.lane.b32.xlu1 %v546_v53, %s2911_s20  ;;  %v561_v53 = vld [vmem:[#allocation2 + $0x1a9] sm:$0xff] }
  0x7f   : > { %627 = vrot.lane.b32.xlu0 %v549_v63, %s2911_s20 }
  0x82   : > { %625 = vrot.lane.b32.xlu1 %v548_v20, %s2911_s20  ;;  %v3330_v20 = vld [vmem:[#allocation2 + $0x191] sm:$0xff] }
  0x83   : > { %631 = vrot.lane.b32.xlu0 %v551_v23, %s2911_s20  ;;  %v563_v23 = vld [vmem:[#allocation2 + $0x1c9] sm:$0xff] }
  0x86   : > { %629 = vrot.lane.b32.xlu1 %v550_v29, %s2911_s20 }
  0x87   : > { %635 = vrot.lane.b32.xlu0 %v3299_v32, %s2911_s20 }
  0x88   : > { %v407_v63 = vpop.permute.xlu0 %406 }
  0x89   : > { %503 = vst.msk [vmem:[#allocation3] sm:$0xff] %vm502_vm1, %v407_v63 }
  0x8a   : > { %633 = vrot.lane.b32.xlu1 %v552_v33, %s2911_s20  ;;  %v562_v33 = vld [vmem:[#allocation2 + $0x1b1] sm:$0xff] }
  0x8b   : > { %639 = vrot.lane.b32.xlu0 %v3304_v34, %s2911_s20 }
  0x8c   : > { %v409_v29 = vpop.permute.xlu0 %408 }
  0x8d   : > { %504 = vst.msk [vmem:[#allocation3 + $0x8] sm:$0xff] %vm502_vm1, %v409_v29 }
  0x8e   : > { %637 = vrot.lane.b32.xlu1 %v3307_v35, %s2911_s20 }
  0x8f   : > { %643 = vrot.lane.b32.xlu0 %v3311_v36, %s2911_s20 }
  0x92   : > { %641 = vrot.lane.b32.xlu1 %v3315_v39, %s2911_s20 }
  0x93   : > { %647 = vrot.lane.b32.xlu0 %v3319_v46, %s2911_s20 }
  0x96   : > { %645 = vrot.lane.b32.xlu1 %v3323_v50, %s2911_s20 }
  0x97   : > { %651 = vrot.lane.b32.xlu0 %v561_v53, %s2911_s20  ;;  %v564_v53 = vld [vmem:[#allocation2 + $0x1d1] sm:$0xff] }
  0x9a   : > { %649 = vrot.lane.b32.xlu1 %v3330_v20, %s2911_s20 }
  0x9b   : > { %655 = vrot.lane.b32.xlu0 %v563_v23, %s2911_s20  ;;  %v566_v23 = vld [vmem:[#allocation2 + $0x1f1] sm:$0xff] }
  0x9c   : > { %v411_v28 = vpop.permute.xlu1 %410 }
  0x9d   : > { %505 = vst.msk [vmem:[#allocation3 + $0x10] sm:$0xff] %vm502_vm1, %v411_v28  ;;  %v415_v16 = vpop.permute.xlu0 %414 }
  0x9e   : > { %653 = vrot.lane.b32.xlu1 %v562_v33, %s2911_s20  ;;  %507 = vst.msk [vmem:[#allocation3 + $0x20] sm:$0xff] %vm502_vm1, %v415_v16 }
  0x9f   : > { %659 = vrot.lane.b32.xlu0 %v565_v22, %s2911_s20 }
  0xa0   : > { %v413_v63 = vpop.permute.xlu1 %412 }
  0xa1   : > { %506 = vst.msk [vmem:[#allocation3 + $0x18] sm:$0xff] %vm502_vm1, %v413_v63  ;;  %v419_v18 = vpop.permute.xlu0 %418 }
  0xa2   : > { %657 = vrot.lane.b32.xlu1 %v564_v53, %s2911_s20  ;;  %509 = vst.msk [vmem:[#allocation3 + $0x30] sm:$0xff] %vm502_vm1, %v419_v18 }
  0xa3   : > { %792 = vrot.lane.b32.xlu0 %v3099_v48, %s2912_s21 }
  0xa4   : > { %v417_v28 = vpop.permute.xlu1 %416 }
  0xa5   : > { %508 = vst.msk [vmem:[#allocation3 + $0x28] sm:$0xff] %vm502_vm1, %v417_v28  ;;  %v423_v16 = vpop.permute.xlu0 %422 }
  0xa6   : > { %661 = vrot.lane.b32.xlu1 %v566_v23, %s2911_s20  ;;  %511 = vst.msk [vmem:[#allocation3 + $0x40] sm:$0xff] %vm502_vm1, %v423_v16 }
  0xa7   : > { %796 = vrot.lane.b32.xlu0 %v3104_v49, %s2912_s21 }
  0xa8   : > { %v421_v22 = vpop.permute.xlu1 %420 }
  0xa9   : > { %510 = vst.msk [vmem:[#allocation3 + $0x38] sm:$0xff] %vm502_vm1, %v421_v22  ;;  %v427_v18 = vpop.permute.xlu0 %426 }
  0xaa   : > { %794 = vrot.lane.b32.xlu1 %v3108_v51, %s2912_s21  ;;  %513 = vst.msk [vmem:[#allocation3 + $0x50] sm:$0xff] %vm502_vm1, %v427_v18 }
  0xab   : > { %800 = vrot.lane.b32.xlu0 %v3110_v52, %s2912_s21 }
  0xac   : > { %v425_v48 = vpop.permute.xlu1 %424 }
  0xad   : > { %512 = vst.msk [vmem:[#allocation3 + $0x48] sm:$0xff] %vm502_vm1, %v425_v48  ;;  %v431_v29 = vpop.permute.xlu0 %430 }
  0xae   : > { %798 = vrot.lane.b32.xlu1 %v3117_v54, %s2912_s21  ;;  %515 = vst.msk [vmem:[#allocation3 + $0x60] sm:$0xff] %vm502_vm1, %v431_v29 }
  0xaf   : > { %804 = vrot.lane.b32.xlu0 %v3119_v55, %s2912_s21 }
  0xb0   : > { %v429_v33 = vpop.permute.xlu1 %428 }
  0xb1   : > { %514 = vst.msk [vmem:[#allocation3 + $0x58] sm:$0xff] %vm502_vm1, %v429_v33  ;;  %v435_v51 = vpop.permute.xlu0 %434 }
  0xb2   : > { %802 = vrot.lane.b32.xlu1 %v3127_v57, %s2912_s21  ;;  %517 = vst.msk [vmem:[#allocation3 + $0x70] sm:$0xff] %vm502_vm1, %v435_v51  ;;  %v1919_v51 = vld [vmem:[%s4048_s1] sm:$0xff] }
  0xb3   : > { %808 = vrot.lane.b32.xlu0 %v3129_v58, %s2912_s21 }
  0xb4   : > { %v433_v53 = vpop.permute.xlu1 %432 }
  0xb5   : > { %516 = vst.msk [vmem:[#allocation3 + $0x68] sm:$0xff] %vm502_vm1, %v433_v53  ;;  %v439_v63 = vpop.permute.xlu0 %438  ;;  %v1920_v53 = vld [vmem:[%s4048_s1 + $0x8] sm:$0xff] }
  0xb6   : > { %806 = vrot.lane.b32.xlu1 %v3131_v59, %s2912_s21  ;;  %519 = vst.msk [vmem:[#allocation3 + $0x80] sm:$0xff] %vm502_vm1, %v439_v63  ;;  %v2742_v63 = vpack.c.bf16 %v1920_v53, %v1919_v51  ;;  %v944_v53 = vld [vmem:[#allocation2 + $0x190] sm:$0xff] }
  0xb7   : > { %812 = vrot.lane.b32.xlu0 %v3140_v60, %s2912_s21 }
  0xb8   : > { %v437_v23 = vpop.permute.xlu1 %436  ;;  %2750 = vmatprep.subr.bf16.mxu1 %v2742_v63  ;;  %2743 = vmatprep.subr.bf16.mxu0 %v2742_v63 }
  0xb9   : > { %518 = vst.msk [vmem:[#allocation3 + $0x78] sm:$0xff] %vm502_vm1, %v437_v23  ;;  %v443_v28 = vpop.permute.xlu0 %442  ;;  %2753 = vmatpush3.bf16.msra.mxu1 %v2742_v63  ;;  %v1921_v23 = vld [vmem:[%s4048_s1 + $0x10] sm:$0xff]  ;;  %2745 = vmatpush3.bf16.msra.mxu0 %v2742_v63 }
  0xba   : > { %810 = vrot.lane.b32.xlu1 %v3142_v61, %s2912_s21  ;;  %521 = vst.msk [vmem:[#allocation3 + $0x90] sm:$0xff] %vm502_vm1, %v443_v28  ;;  %v1922_v28 = vld [vmem:[%s4048_s1 + $0x18] sm:$0xff] }
  0xbb   : > { %816 = vrot.lane.b32.xlu0 %v3144_v62, %s2912_s21 }
  0xbc   : > { %v441_v16 = vpop.permute.xlu1 %440 }
  0xbd   : > { %520 = vst.msk [vmem:[#allocation3 + $0x88] sm:$0xff] %vm502_vm1, %v441_v16  ;;  %v447_v22 = vpop.permute.xlu0 %446  ;;  %v2746_v16 = vpack.c.bf16 %v1922_v28, %v1921_v23  ;;  %v244_v28 = vld [vmem:[%s3004_s18 + $0xf0] sm:$0xff] }
  0xbe   : > { %814 = vrot.lane.b32.xlu1 %v3152_v0, %s2912_s21  ;;  %523 = vst.msk [vmem:[#allocation3 + $0xa0] sm:$0xff] %vm502_vm1, %v447_v22 }
  0xbf   : > { %820 = vrot.lane.b32.xlu0 %v3154_v1, %s2912_s21  ;;  %2751 = vmatprep.subr.bf16.mxu1 %v2746_v16  ;;  %276 = vst.msk [vmem:[#allocation2 + $0x208] sm:$0xff] %vm171_vm0, %v244_v28 }
  0xc0   : > { %v445_v60 = vpop.permute.xlu1 %444  ;;  %2747 = vmatprep.subr.bf16.mxu0 %v2746_v16  ;;  %2754 = vmatpush3.bf16.msra.mxu1 %v2746_v16 }
  0xc1   : > { %522 = vst.msk [vmem:[#allocation3 + $0x98] sm:$0xff] %vm502_vm1, %v445_v60  ;;  %v451_v18 = vpop.permute.xlu0 %450  ;;  %2749 = vmatpush3.bf16.msra.mxu0 %v2746_v16  ;;  %v245_v16 = vld [vmem:[%s3004_s18 + $0xf8] sm:$0xff] }
  0xc2   : > { %818 = vrot.lane.b32.xlu1 %v3156_v2, %s2912_s21  ;;  %525 = vst.msk [vmem:[#allocation3 + $0xb0] sm:$0xff] %vm502_vm1, %v451_v18 }
  0xc3   : > { %824 = vrot.lane.b32.xlu0 %v3165_v3, %s2912_s21  ;;  %277 = vst.msk [vmem:[#allocation2 + $0x210] sm:$0xff] %vm171_vm0, %v245_v16 }
  0xc4   : > { %v449_v62 = vpop.permute.xlu1 %448 }
  0xc5   : > { %524 = vst.msk [vmem:[#allocation3 + $0xa8] sm:$0xff] %vm502_vm1, %v449_v62  ;;  %v455_v0 = vpop.permute.xlu0 %454  ;;  %v1923_v62 = vld [vmem:[%s4048_s1 + $0x20] sm:$0xf] }
  0xc6   : > { %822 = vrot.lane.b32.xlu1 %v3167_v4, %s2912_s21  ;;  %527 = vst.msk [vmem:[#allocation3 + $0xc0] sm:$0xff] %vm502_vm1, %v455_v0  ;;  %2752 = vmatprep.subr.msk.mxu1 %vm2028_vm3, %v1923_v62 }
  0xc7   : > { %828 = vrot.lane.b32.xlu0 %v3169_v5, %s2912_s21  ;;  %2692 = vmatprep.subr.msk.mxu0 %vm2028_vm3, %v1923_v62 }
  0xc8   : > { %v453_v1 = vpop.permute.xlu1 %452  ;;  %2755 = vmatpush3.msk.msra.mxu1 %vm2028_vm3, %v1923_v62  ;;  %2693 = vmatpush3.msk.msra.mxu0 %vm2028_vm3, %v1923_v62 }
  0xc9   : > { %526 = vst.msk [vmem:[#allocation3 + $0xb8] sm:$0xff] %vm502_vm1, %v453_v1  ;;  %v459_v2 = vpop.permute.xlu0 %458 }
  0xca   : > { %826 = vrot.lane.b32.xlu1 %v3177_v6, %s2912_s21  ;;  %529 = vst.msk [vmem:[#allocation3 + $0xd0] sm:$0xff] %vm502_vm1, %v459_v2 }
  0xcb   : > { %832 = vrot.lane.b32.xlu0 %v3179_v7, %s2912_s21 }
  0xcc   : > { %v457_v3 = vpop.permute.xlu1 %456 }
  0xcd   : > { %528 = vst.msk [vmem:[#allocation3 + $0xc8] sm:$0xff] %vm502_vm1, %v457_v3  ;;  %v463_v4 = vpop.permute.xlu0 %462 }
  0xce   : > { %830 = vrot.lane.b32.xlu1 %v3181_v8, %s2912_s21  ;;  %531 = vst.msk [vmem:[#allocation3 + $0xe0] sm:$0xff] %vm502_vm1, %v463_v4 }
  0xcf   : > { %1017 = vrot.lane.b32.xlu0 %v3121_v56, %s2913_s22 }
  0xd0   : > { %v461_v48 = vpop.permute.xlu1 %460 }
  0xd1   : > { %530 = vst.msk [vmem:[#allocation3 + $0xd8] sm:$0xff] %vm502_vm1, %v461_v48  ;;  %v467_v6 = vpop.permute.xlu0 %466 }
  0xd2   : > { %985 = vrot.lane.b32.xlu1 %v3049_v25, %s2913_s22  ;;  %533 = vst.msk [vmem:[#allocation3 + $0xf0] sm:$0xff] %vm502_vm1, %v467_v6 }
  0xd3   : > { %1019 = vrot.lane.b32.xlu0 %v3206_v13, %s2913_s22 }
  0xd4   : > { %v465_v29 = vpop.permute.xlu1 %464 }
  0xd5   : > { %532 = vst.msk [vmem:[#allocation3 + $0xe8] sm:$0xff] %vm502_vm1, %v465_v29  ;;  %v600_v33 = vpop.permute.xlu0 %599 }
  0xd6   : > { %987 = vrot.lane.b32.xlu1 %v3058_v27, %s2913_s22  ;;  %696 = vst.msk [vmem:[#allocation3] sm:$0xff] %vm695_vm2, %v600_v33 }
  0xd7   : > { %1210 = vrot.lane.b32.xlu0 %v3299_v32, %s2914_s23 }
  0xd8   : > { %v469_v25 = vpop.permute.xlu1 %468 }
  0xd9   : > { %534 = vst.msk [vmem:[#allocation3 + $0xf8] sm:$0xff] %vm502_vm1, %v469_v25  ;;  %v604_v56 = vpop.permute.xlu0 %603 }
  0xda   : > { %1178 = vrot.lane.b32.xlu1 %v3259_v37, %s2914_s23  ;;  %698 = vst.msk [vmem:[#allocation3 + $0x10] sm:$0xff] %vm695_vm2, %v604_v56 }
  0xdb   : > { %1212 = vrot.lane.b32.xlu0 %v3307_v35, %s2914_s23 }
  0xdc   : > { %v602_v13 = vpop.permute.xlu1 %601 }
  0xdd   : > { %697 = vst.msk [vmem:[#allocation3 + $0x8] sm:$0xff] %vm695_vm2, %v602_v13  ;;  %v608_v27 = vpop.permute.xlu0 %607 }
  0xde   : > { %1180 = vrot.lane.b32.xlu1 %v3267_v41, %s2914_s23  ;;  %700 = vst.msk [vmem:[#allocation3 + $0x20] sm:$0xff] %vm695_vm2, %v608_v27 }
  0xdf   : > { %1404 = vrot.lane.b32.xlu0 %v3169_v5, %s2915_s24 }
  0xe0   : > { %v606_v32 = vpop.permute.xlu1 %605 }
  0xe1   : > { %699 = vst.msk [vmem:[#allocation3 + $0x18] sm:$0xff] %vm695_vm2, %v606_v32  ;;  %v612_v37 = vpop.permute.xlu0 %611 }
  0xe2   : > { %1372 = vrot.lane.b32.xlu1 %v3104_v49, %s2915_s24  ;;  %702 = vst.msk [vmem:[#allocation3 + $0x30] sm:$0xff] %vm695_vm2, %v612_v37  ;;  %v1505_v37 = vld [vmem:[#allocation2 + $0x88] sm:$0xff] }
  0xe3   : > { %1406 = vrot.lane.b32.xlu0 %v3181_v8, %s2915_s24 }
  0xe4   : > { %v610_v35 = vpop.permute.xlu1 %609 }
  0xe5   : > { %701 = vst.msk [vmem:[#allocation3 + $0x28] sm:$0xff] %vm695_vm2, %v610_v35  ;;  %v616_v41 = vpop.permute.xlu0 %615 }
  0xe6   : > { %1374 = vrot.lane.b32.xlu1 %v3117_v54, %s2915_s24  ;;  %704 = vst.msk [vmem:[#allocation3 + $0x40] sm:$0xff] %vm695_vm2, %v616_v41 }
  0xe7   : > { %1597 = vrot.lane.b32.xlu0 %v3195_v11, %s2916_s25 }
  0xe8   : > { %v614_v5 = vpop.permute.xlu1 %613 }
  0xe9   : > { %703 = vst.msk [vmem:[#allocation3 + $0x38] sm:$0xff] %vm695_vm2, %v614_v5  ;;  %v620_v49 = vpop.permute.xlu0 %619 }
  0xea   : > { %1565 = vrot.lane.b32.xlu1 %v3051_v26, %s2916_s25  ;;  %706 = vst.msk [vmem:[#allocation3 + $0x50] sm:$0xff] %vm695_vm2, %v620_v49 }
  0xeb   : > { %1021 = vrot.lane.b32.xlu0 %v3195_v11, %s2913_s22 }
  0xec   : > { %v618_v8 = vpop.permute.xlu1 %617 }
  0xed   : > { %705 = vst.msk [vmem:[#allocation3 + $0x48] sm:$0xff] %vm695_vm2, %v618_v8  ;;  %v624_v54 = vpop.permute.xlu0 %623 }
  0xee   : > { %989 = vrot.lane.b32.xlu1 %v3051_v26, %s2913_s22  ;;  %708 = vst.msk [vmem:[#allocation3 + $0x60] sm:$0xff] %vm695_vm2, %v624_v54 }
  0xef   : > { %1599 = vrot.lane.b32.xlu0 %v3222_v17, %s2916_s25 }
  0xf0   : > { %v622_v11 = vpop.permute.xlu1 %621 }
  0xf1   : > { %707 = vst.msk [vmem:[#allocation3 + $0x58] sm:$0xff] %vm695_vm2, %v622_v11  ;;  %v628_v26 = vpop.permute.xlu0 %627 }
  0xf2   : > { %1567 = vrot.lane.b32.xlu1 %v3070_v31, %s2916_s25  ;;  %710 = vst.msk [vmem:[#allocation3 + $0x70] sm:$0xff] %vm695_vm2, %v628_v26 }
  0xf3   : > { %1790 = vrot.lane.b32.xlu0 %v3304_v34, %s2917_s7 }
  0xf4   : > { %v626_v22 = vpop.permute.xlu1 %625 }
  0xf5   : > { %709 = vst.msk [vmem:[#allocation3 + $0x68] sm:$0xff] %vm695_vm2, %v626_v22  ;;  %v632_v60 = vpop.permute.xlu0 %631 }
  0xf6   : > { %1758 = vrot.lane.b32.xlu1 %v3264_v40, %s2917_s7  ;;  %712 = vst.msk [vmem:[#allocation3 + $0x80] sm:$0xff] %vm695_vm2, %v632_v60  ;;  %v4063_v60 = vld [vmem:[#allocation5_spill] sm:$0xff] }
  0xf7   : > { %1023 = vrot.lane.b32.xlu0 %v3222_v17, %s2913_s22 }
  0xf8   : > { %v630_v18 = vpop.permute.xlu1 %629 }
  0xf9   : > { %711 = vst.msk [vmem:[#allocation3 + $0x78] sm:$0xff] %vm695_vm2, %v630_v18  ;;  %v636_v0 = vpop.permute.xlu0 %635  ;;  %v1523_v18 = vld [vmem:[#allocation2 + $0x1a8] sm:$0xff] }
  0xfa   : > { %991 = vrot.lane.b32.xlu1 %v3070_v31, %s2913_s22  ;;  %714 = vst.msk [vmem:[#allocation3 + $0x90] sm:$0xff] %vm695_vm2, %v636_v0  ;;  %v1507_v0 = vld [vmem:[#allocation2 + $0xa8] sm:$0xff] }
  0xfb   : > { %1214 = vrot.lane.b32.xlu0 %v3304_v34, %s2914_s23 }
  0xfc   : > { %v634_v17 = vpop.permute.xlu1 %633 }
  0xfd   : > { %713 = vst.msk [vmem:[#allocation3 + $0x88] sm:$0xff] %vm695_vm2, %v634_v17  ;;  %v640_v1 = vpop.permute.xlu0 %639 }
  0xfe   : > { %1182 = vrot.lane.b32.xlu1 %v3264_v40, %s2914_s23  ;;  %716 = vst.msk [vmem:[#allocation3 + $0xa0] sm:$0xff] %vm695_vm2, %v640_v1 }
  0xff   : > { %1792 = vrot.lane.b32.xlu0 %v3315_v39, %s2917_s7 }
 0x100   : > { %v638_v31 = vpop.permute.xlu1 %637 }
 0x101   : > { %715 = vst.msk [vmem:[#allocation3 + $0x98] sm:$0xff] %vm695_vm2, %v638_v31  ;;  %v644_v2 = vpop.permute.xlu0 %643  ;;  %v1508_v31 = vld [vmem:[#allocation2 + $0xb0] sm:$0xff] }
 0x102   : > { %1760 = vrot.lane.b32.xlu1 %v3275_v43, %s2917_s7  ;;  %718 = vst.msk [vmem:[#allocation3 + $0xb0] sm:$0xff] %vm695_vm2, %v644_v2 }
 0x103   : > { %1216 = vrot.lane.b32.xlu0 %v3315_v39, %s2914_s23 }
 0x104   : > { %v642_v34 = vpop.permute.xlu1 %641 }
 0x105   : > { %717 = vst.msk [vmem:[#allocation3 + $0xa8] sm:$0xff] %vm695_vm2, %v642_v34  ;;  %v648_v40 = vpop.permute.xlu0 %647 }
 0x106   : > { %1184 = vrot.lane.b32.xlu1 %v3275_v43, %s2914_s23  ;;  %720 = vst.msk [vmem:[#allocation3 + $0xc0] sm:$0xff] %vm695_vm2, %v648_v40 }
 0x107   : > { %1408 = vrot.lane.b32.xlu0 %v3179_v7, %s2915_s24 }
 0x108   : > { %v646_v3 = vpop.permute.xlu1 %645 }
 0x109   : > { %719 = vst.msk [vmem:[#allocation3 + $0xb8] sm:$0xff] %vm695_vm2, %v646_v3  ;;  %v652_v4 = vpop.permute.xlu0 %651  ;;  %v1700_v3 = vld [vmem:[#allocation2 + $0xa9] sm:$0xff] }
 0x10a   : > { %1376 = vrot.lane.b32.xlu1 %v3110_v52, %s2915_s24  ;;  %722 = vst.msk [vmem:[#allocation3 + $0xd0] sm:$0xff] %vm695_vm2, %v652_v4 }
 0x10b   : > { %1410 = vrot.lane.b32.xlu0 %v3193_v10, %s2915_s24 }
 0x10c   : > { %v650_v39 = vpop.permute.xlu1 %649 }
 0x10d   : > { %721 = vst.msk [vmem:[#allocation3 + $0xc8] sm:$0xff] %vm695_vm2, %v650_v39  ;;  %v656_v43 = vpop.permute.xlu0 %655  ;;  %v1524_v39 = vld [vmem:[#allocation2 + $0x1b0] sm:$0xff] }
 0x10e   : > { %1378 = vrot.lane.b32.xlu1 %v3127_v57, %s2915_s24  ;;  %724 = vst.msk [vmem:[#allocation3 + $0xe0] sm:$0xff] %vm695_vm2, %v656_v43 }
 0x10f   : > { %1601 = vrot.lane.b32.xlu0 %v3214_v15, %s2916_s25 }
 0x110   : > { %v654_v7 = vpop.permute.xlu1 %653 }
 0x111   : > { %723 = vst.msk [vmem:[#allocation3 + $0xd8] sm:$0xff] %vm695_vm2, %v654_v7  ;;  %v660_v52 = vpop.permute.xlu0 %659 }
 0x112   : > { %1569 = vrot.lane.b32.xlu1 %v3066_v30, %s2916_s25  ;;  %726 = vst.msk [vmem:[#allocation3 + $0xf0] sm:$0xff] %vm695_vm2, %v660_v52  ;;  %v1716_v52 = vld [vmem:[#allocation2 + $0x1a9] sm:$0xff] }
 0x113   : > { %993 = vrot.lane.b32.xlu0 %v3066_v30, %s2913_s22 }
 0x114   : > { %v658_v48 = vpop.permute.xlu1 %657 }
 0x115   : > { %725 = vst.msk [vmem:[#allocation3 + $0xe8] sm:$0xff] %vm695_vm2, %v658_v48  ;;  %v793_v57 = vpop.permute.xlu0 %792 }
 0x116   : > { %834 = vrot.lane.b32.xlu1 %v3193_v10, %s2912_s21  ;;  %889 = vst.msk [vmem:[#allocation3] sm:$0xff] %vm888_vm4, %v793_v57 }
 0x117   : > { %1571 = vrot.lane.b32.xlu0 %v3084_v38, %s2916_s25 }
 0x118   : > { %v662_v6 = vpop.permute.xlu1 %661 }
 0x119   : > { %727 = vst.msk [vmem:[#allocation3 + $0xf8] sm:$0xff] %vm695_vm2, %v662_v6  ;;  %v797_v29 = vpop.permute.xlu0 %796 }
 0x11a   : > { %1025 = vrot.lane.b32.xlu1 %v3214_v15, %s2913_s22  ;;  %891 = vst.msk [vmem:[#allocation3 + $0x10] sm:$0xff] %vm888_vm4, %v797_v29 }
 0x11b   : > { %1762 = vrot.lane.b32.xlu0 %v3271_v42, %s2917_s7 }
 0x11c   : > { %v795_v30 = vpop.permute.xlu1 %794 }
 0x11d   : > { %890 = vst.msk [vmem:[#allocation3 + $0x8] sm:$0xff] %vm888_vm4, %v795_v30  ;;  %v801_v10 = vpop.permute.xlu0 %800 }
 0x11e   : > { %1603 = vrot.lane.b32.xlu1 %v3235_v21, %s2916_s25  ;;  %893 = vst.msk [vmem:[#allocation3 + $0x20] sm:$0xff] %vm888_vm4, %v801_v10  ;;  %v1701_v10 = vld [vmem:[#allocation2 + $0xb1] sm:$0xff] }
 0x11f   : > { %995 = vrot.lane.b32.xlu0 %v3084_v38, %s2913_s22 }
 0x120   : > { %v799_v33 = vpop.permute.xlu1 %798 }
 0x121   : > { %892 = vst.msk [vmem:[#allocation3 + $0x18] sm:$0xff] %vm888_vm4, %v799_v33  ;;  %v805_v15 = vpop.permute.xlu0 %804 }
 0x122   : > { %1794 = vrot.lane.b32.xlu1 %v3311_v36, %s2917_s7  ;;  %895 = vst.msk [vmem:[#allocation3 + $0x30] sm:$0xff] %vm888_vm4, %v805_v15 }
 0x123   : > { %1186 = vrot.lane.b32.xlu0 %v3271_v42, %s2914_s23 }
 0x124   : > { %v803_v25 = vpop.permute.xlu1 %802 }
 0x125   : > { %894 = vst.msk [vmem:[#allocation3 + $0x28] sm:$0xff] %vm888_vm4, %v803_v25  ;;  %v809_v56 = vpop.permute.xlu0 %808 }
 0x126   : > { %1027 = vrot.lane.b32.xlu1 %v3235_v21, %s2913_s22  ;;  %897 = vst.msk [vmem:[#allocation3 + $0x40] sm:$0xff] %vm888_vm4, %v809_v56  ;;  %v1717_v56 = vld [vmem:[#allocation2 + $0x1b1] sm:$0xff] }
 0x127   : > { %1764 = vrot.lane.b32.xlu0 %v3283_v45, %s2917_s7 }
 0x128   : > { %v807_v38 = vpop.permute.xlu1 %806 }
 0x129   : > { %896 = vst.msk [vmem:[#allocation3 + $0x38] sm:$0xff] %vm888_vm4, %v807_v38  ;;  %v813_v13 = vpop.permute.xlu0 %812 }
 0x12a   : > { %1218 = vrot.lane.b32.xlu1 %v3311_v36, %s2914_s23  ;;  %899 = vst.msk [vmem:[#allocation3 + $0x50] sm:$0xff] %vm888_vm4, %v813_v13  ;;  %v1316_v13 = vld [vmem:[#allocation2 + $0xc7] sm:$0xff] }
 0x12b   : > { %1188 = vrot.lane.b32.xlu0 %v3283_v45, %s2914_s23 }
 0x12c   : > { %v811_v42 = vpop.permute.xlu1 %810 }
 0x12d   : > { %898 = vst.msk [vmem:[#allocation3 + $0x48] sm:$0xff] %vm888_vm4, %v811_v42  ;;  %v817_v21 = vpop.permute.xlu0 %816 }
 0x12e   : > { %1796 = vrot.lane.b32.xlu1 %v3323_v50, %s2917_s7  ;;  %901 = vst.msk [vmem:[#allocation3 + $0x60] sm:$0xff] %vm888_vm4, %v817_v21 }
 0x12f   : > { %1380 = vrot.lane.b32.xlu0 %v3119_v55, %s2915_s24 }
 0x130   : > { %v815_v27 = vpop.permute.xlu1 %814 }
 0x131   : > { %900 = vst.msk [vmem:[#allocation3 + $0x58] sm:$0xff] %vm888_vm4, %v815_v27  ;;  %v821_v36 = vpop.permute.xlu0 %820 }
 0x132   : > { %1220 = vrot.lane.b32.xlu1 %v3323_v50, %s2914_s23  ;;  %903 = vst.msk [vmem:[#allocation3 + $0x70] sm:$0xff] %vm888_vm4, %v821_v36  ;;  %v4064_v36 = vld [vmem:[#allocation4_spill] sm:$0xff] }
 0x133   : > { %836 = vrot.lane.b32.xlu0 %v3191_v9, %s2912_s21 }
 0x134   : > { %v819_v45 = vpop.permute.xlu1 %818 }
 0x135   : > { %902 = vst.msk [vmem:[#allocation3 + $0x68] sm:$0xff] %vm888_vm4, %v819_v45  ;;  %v825_v32 = vpop.permute.xlu0 %824 }
 0x136   : > { %1412 = vrot.lane.b32.xlu1 %v3191_v9, %s2915_s24  ;;  %905 = vst.msk [vmem:[#allocation3 + $0x80] sm:$0xff] %vm888_vm4, %v825_v32 }
 0x137   : > { %1414 = vrot.lane.b32.xlu0 %v3208_v14, %s2915_s24 }
 0x138   : > { %v823_v55 = vpop.permute.xlu1 %822 }
 0x139   : > { %904 = vst.msk [vmem:[#allocation3 + $0x78] sm:$0xff] %vm888_vm4, %v823_v55  ;;  %v829_v50 = vpop.permute.xlu0 %828  ;;  %v1317_v55 = vld [vmem:[#allocation2 + $0xcf] sm:$0xff] }
 0x13a   : > { %1382 = vrot.lane.b32.xlu1 %v3131_v59, %s2915_s24  ;;  %907 = vst.msk [vmem:[#allocation3 + $0x90] sm:$0xff] %vm888_vm4, %v829_v50  ;;  %v1506_v59 = vld [vmem:[#allocation2 + $0x90] sm:$0xff] }
 0x13b   : > { %1605 = vrot.lane.b32.xlu0 %v3230_v19, %s2916_s25  ;;  %v4065_v50 = vld [vmem:[#allocation6_spill] sm:$0xff] }
 0x13c   : > { %v827_v35 = vpop.permute.xlu1 %826 }
 0x13d   : > { %906 = vst.msk [vmem:[#allocation3 + $0x88] sm:$0xff] %vm888_vm4, %v827_v35  ;;  %v833_v9 = vpop.permute.xlu0 %832  ;;  %v1525_v35 = vld [vmem:[#allocation2 + $0x1c8] sm:$0xff] }
 0x13e   : > { %1573 = vrot.lane.b32.xlu1 %v1505_v37, %s2916_s25  ;;  %909 = vst.msk [vmem:[#allocation3 + $0xa0] sm:$0xff] %vm888_vm4, %v833_v9 }
 0x13f   : > { %997 = vrot.lane.b32.xlu0 %v1505_v37, %s2913_s22 }
 0x140   : > { %v831_v41 = vpop.permute.xlu1 %830 }
 0x141   : > { %908 = vst.msk [vmem:[#allocation3 + $0x98] sm:$0xff] %vm888_vm4, %v831_v41  ;;  %v1018_v5 = vpop.permute.xlu0 %1017  ;;  %v1509_v41 = vld [vmem:[#allocation2 + $0xc8] sm:$0xff] }
 0x142   : > { %838 = vrot.lane.b32.xlu1 %v3208_v14, %s2912_s21  ;;  %1098 = vst.msk [vmem:[#allocation3 + $0x80] sm:$0xff] %vm1081_vm5, %v1018_v5 }
 0x143   : > { %1575 = vrot.lane.b32.xlu0 %v1506_v59, %s2916_s25 }
 0x144   : > { %v986_v49 = vpop.permute.xlu1 %985 }
 0x145   : > { %1082 = vst.msk [vmem:[#allocation3] sm:$0xff] %vm1081_vm5, %v986_v49  ;;  %v1020_v8 = vpop.permute.xlu0 %1019 }
 0x146   : > { %1029 = vrot.lane.b32.xlu1 %v3230_v19, %s2913_s22  ;;  %1099 = vst.msk [vmem:[#allocation3 + $0x88] sm:$0xff] %vm1081_vm5, %v1020_v8 }
 0x147   : > { %1766 = vrot.lane.b32.xlu0 %v3279_v44, %s2917_s7 }
 0x148   : > { %v988_v54 = vpop.permute.xlu1 %987 }
 0x149   : > { %1083 = vst.msk [vmem:[#allocation3 + $0x8] sm:$0xff] %vm1081_vm5, %v988_v54  ;;  %v1211_v14 = vpop.permute.xlu0 %1210  ;;  %v1510_v54 = vld [vmem:[#allocation2 + $0xd0] sm:$0xff] }
 0x14a   : > { %1607 = vrot.lane.b32.xlu1 %v3245_v24, %s2916_s25  ;;  %1291 = vst.msk [vmem:[#allocation3 + $0x80] sm:$0xff] %vm1274_vm6, %v1211_v14 }
 0x14b   : > { %999 = vrot.lane.b32.xlu0 %v1506_v59, %s2913_s22 }
 0x14c   : > { %v1179_v51 = vpop.permute.xlu1 %1178 }
 0x14d   : > { %1275 = vst.msk [vmem:[#allocation3] sm:$0xff] %vm1274_vm6, %v1179_v51  ;;  %v1213_v19 = vpop.permute.xlu0 %1212 }
 0x14e   : > { %1798 = vrot.lane.b32.xlu1 %v3319_v46, %s2917_s7  ;;  %1292 = vst.msk [vmem:[#allocation3 + $0x88] sm:$0xff] %vm1274_vm6, %v1213_v19 }
 0x14f   : > { %1190 = vrot.lane.b32.xlu0 %v3279_v44, %s2914_s23 }
 0x150   : > { %v1181_v63 = vpop.permute.xlu1 %1180 }
 0x151   : > { %1276 = vst.msk [vmem:[#allocation3 + $0x8] sm:$0xff] %vm1274_vm6, %v1181_v63  ;;  %v1405_v24 = vpop.permute.xlu0 %1404 }
 0x152   : > { %1031 = vrot.lane.b32.xlu1 %v944_v53, %s2913_s22  ;;  %1485 = vst.msk [vmem:[#allocation3 + $0x80] sm:$0xff] %vm1468_vm7, %v1405_v24  ;;  %v1702_v53 = vld [vmem:[#allocation2 + $0xc9] sm:$0xff] }
 0x153   : > { %1768 = vrot.lane.b32.xlu0 %v3289_v47, %s2917_s7  ;;  %v1526_v24 = vld [vmem:[#allocation2 + $0x1d0] sm:$0xff] }
 0x154   : > { %v1373_v11 = vpop.permute.xlu1 %1372 }
 0x155   : > { %1469 = vst.msk [vmem:[#allocation3] sm:$0xff] %vm1468_vm7, %v1373_v11  ;;  %v1407_v26 = vpop.permute.xlu0 %1406 }
 0x156   : > { %1222 = vrot.lane.b32.xlu1 %v3319_v46, %s2914_s23  ;;  %1486 = vst.msk [vmem:[#allocation3 + $0x88] sm:$0xff] %vm1468_vm7, %v1407_v26 }
 0x157   : > { %1192 = vrot.lane.b32.xlu0 %v3289_v47, %s2914_s23 }
 0x158   : > { %v1375_v44 = vpop.permute.xlu1 %1374 }
 0x159   : > { %1470 = vst.msk [vmem:[#allocation3 + $0x8] sm:$0xff] %vm1468_vm7, %v1375_v44  ;;  %v1598_v23 = vpop.permute.xlu0 %1597 }
 0x15a   : > { %1800 = vrot.lane.b32.xlu1 %v3330_v20, %s2917_s7  ;;  %1678 = vst.msk [vmem:[#allocation3 + $0x80] sm:$0xff] %vm1661_vm8, %v1598_v23  ;;  %v1718_v23 = vld [vmem:[#allocation2 + $0x1c9] sm:$0xff] }
 0x15b   : > { %1384 = vrot.lane.b32.xlu0 %v3129_v58, %s2915_s24 }
 0x15c   : > { %v1566_v46 = vpop.permute.xlu1 %1565 }
 0x15d   : > { %1662 = vst.msk [vmem:[#allocation3] sm:$0xff] %vm1661_vm8, %v1566_v46  ;;  %v1022_v47 = vpop.permute.xlu0 %1021 }
 0x15e   : > { %1224 = vrot.lane.b32.xlu1 %v3330_v20, %s2914_s23  ;;  %1100 = vst.msk [vmem:[#allocation3 + $0x90] sm:$0xff] %vm1081_vm5, %v1022_v47 }
 0x15f   : > { %840 = vrot.lane.b32.xlu0 %v3201_v12, %s2912_s21 }
 0x160   : > { %v990_v22 = vpop.permute.xlu1 %989 }
 0x161   : > { %1084 = vst.msk [vmem:[#allocation3 + $0x10] sm:$0xff] %vm1081_vm5, %v990_v22  ;;  %v1600_v58 = vpop.permute.xlu0 %1599  ;;  %v1703_v22 = vld [vmem:[#allocation2 + $0xd1] sm:$0xff] }
 0x162   : > { %1416 = vrot.lane.b32.xlu1 %v3201_v12, %s2915_s24  ;;  %1679 = vst.msk [vmem:[#allocation3 + $0x88] sm:$0xff] %vm1661_vm8, %v1600_v58 }
 0x163   : > { %1418 = vrot.lane.b32.xlu0 %v4063_v60, %s2915_s24 }
 0x164   : > { %v1568_v20 = vpop.permute.xlu1 %1567 }
 0x165   : > { %1663 = vst.msk [vmem:[#allocation3 + $0x8] sm:$0xff] %vm1661_vm8, %v1568_v20  ;;  %v1791_v62 = vpop.permute.xlu0 %1790 }
 0x166   : > { %1386 = vrot.lane.b32.xlu1 %v3142_v61, %s2915_s24  ;;  %1871 = vst.msk [vmem:[#allocation3 + $0x80] sm:$0xff] %vm1854_vm9, %v1791_v62 }
 0x167   : > { %1609 = vrot.lane.b32.xlu0 %v1523_v18, %s2916_s25 }
 0x168   : > { %v1759_v12 = vpop.permute.xlu1 %1758 }
 0x169   : > { %1855 = vst.msk [vmem:[#allocation3] sm:$0xff] %vm1854_vm9, %v1759_v12  ;;  %v1024_v17 = vpop.permute.xlu0 %1023 }
 0x16a   : > { %1577 = vrot.lane.b32.xlu1 %v1507_v0, %s2916_s25  ;;  %1101 = vst.msk [vmem:[#allocation3 + $0x98] sm:$0xff] %vm1081_vm5, %v1024_v17 }
 0x16b   : > { %1001 = vrot.lane.b32.xlu0 %v1507_v0, %s2913_s22  ;;  %v1318_v0 = vld [vmem:[#allocation2 + $0xe7] sm:$0xff] }
 0x16c   : > { %v992_v1 = vpop.permute.xlu1 %991 }
 0x16d   : > { %1085 = vst.msk [vmem:[#allocation3 + $0x18] sm:$0xff] %vm1081_vm5, %v992_v1  ;;  %v1215_v61 = vpop.permute.xlu0 %1214  ;;  %v1903_v2 = vld [vmem:[#allocation3 + $0x80] sm:$0xff] }
 0x16e   : > { %842 = vrot.lane.b32.xlu1 %v4063_v60, %s2912_s21  ;;  %1293 = vst.msk [vmem:[#allocation3 + $0x90] sm:$0xff] %vm1274_vm6, %v1215_v61  ;;  %2718 = vmatprep.mubr.msk.f32.mxu1 %vm1931_vm10, %v1903_v2  ;;  %v756_v1 = vld [vmem:[#allocation2 + $0x1e7] sm:$0xff] }
 0x16f   : > { %1579 = vrot.lane.b32.xlu0 %v1508_v31, %s2916_s25 }
 0x170   : > { %v1183_v34 = vpop.permute.xlu1 %1182  ;;  %v1887_v40 = vld [vmem:[#allocation3] sm:$0xff] }
 0x171   : > { %1277 = vst.msk [vmem:[#allocation3 + $0x10] sm:$0xff] %vm1274_vm6, %v1183_v34  ;;  %2694 = vmatprep.mubr.msk.f32.mxu0 %vm1931_vm10, %v1887_v40  ;;  %v1793_v4 = vpop.permute.xlu0 %1792  ;;  %v1319_v34 = vld [vmem:[#allocation2 + $0xef] sm:$0xff]  ;;  %v4066_v40 = vld [vmem:[#allocation7_spill] sm:$0xff] }
 0x172   : > { %1033 = vrot.lane.b32.xlu1 %v1523_v18, %s2913_s22  ;;  %1872 = vst.msk [vmem:[#allocation3 + $0x88] sm:$0xff] %vm1854_vm9, %v1793_v4  ;;  %v1719_v18 = vld [vmem:[#allocation2 + $0x1d1] sm:$0xff]  ;;  %v1527_v4 = vld [vmem:[#allocation2 + $0x1e8] sm:$0xff] }
 0x173   : > { %1770 = vrot.lane.b32.xlu0 %v1700_v3, %s2917_s7 }
 0x174   : > { %v1761_v43 = vpop.permute.xlu1 %1760 }
 0x175   : > { %1856 = vst.msk [vmem:[#allocation3 + $0x8] sm:$0xff] %vm1854_vm9, %v1761_v43  ;;  %v1217_v7 = vpop.permute.xlu0 %1216  ;;  %v1511_v43 = vld [vmem:[#allocation2 + $0xe8] sm:$0xff] }
 0x176   : > { %1611 = vrot.lane.b32.xlu1 %v1524_v39, %s2916_s25  ;;  %1294 = vst.msk [vmem:[#allocation3 + $0x98] sm:$0xff] %vm1274_vm6, %v1217_v7 }
 0x177   : > { %1003 = vrot.lane.b32.xlu0 %v1508_v31, %s2913_s22 }
 0x178   : > { %v1185_v48 = vpop.permute.xlu1 %1184 }
 0x179   : > { %1278 = vst.msk [vmem:[#allocation3 + $0x18] sm:$0xff] %vm1274_vm6, %v1185_v48  ;;  %v1409_v57 = vpop.permute.xlu0 %1408  ;;  %v1904_v6 = vld [vmem:[#allocation3 + $0x88] sm:$0xff] }
 0x17a   : > { %1802 = vrot.lane.b32.xlu1 %v1716_v52, %s2917_s7  ;;  %1487 = vst.msk [vmem:[#allocation3 + $0x90] sm:$0xff] %vm1468_vm7, %v1409_v57  ;;  %2719 = vmatmul.mubr.msk.f32.vlgmr.msra.gmra.mrb[0].mxu1 %vm1931_vm10, %v1904_v6  ;;  %v757_v57 = vld [vmem:[#allocation2 + $0x1ef] sm:$0xff] }
 0x17b   : > { %1194 = vrot.lane.b32.xlu0 %v1700_v3, %s2914_s23 }
 0x17c   : > { %v1377_v29 = vpop.permute.xlu1 %1376  ;;  %v1888_v30 = vld [vmem:[#allocation3 + $0x8] sm:$0xff] }
 0x17d   : > { %1471 = vst.msk [vmem:[#allocation3 + $0x10] sm:$0xff] %vm1468_vm7, %v1377_v29  ;;  %2695 = vmatmul.mubr.msk.f32.vlgmr.msra.gmra.mrb[0].mxu0 %vm1931_vm10, %v1888_v30  ;;  %v1411_v33 = vpop.permute.xlu0 %1410  ;;  %v1512_v29 = vld [vmem:[#allocation2 + $0xf0] sm:$0xff] }
 0x17e   : > { %1035 = vrot.lane.b32.xlu1 %v1524_v39, %s2913_s22  ;;  %1488 = vst.msk [vmem:[#allocation3 + $0x98] sm:$0xff] %vm1468_vm7, %v1411_v33 }
 0x17f   : > { %1772 = vrot.lane.b32.xlu0 %v1701_v10, %s2917_s7 }
 0x180   : > { %v1379_v15 = vpop.permute.xlu1 %1378 }
 0x181   : > { %1472 = vst.msk [vmem:[#allocation3 + $0x18] sm:$0xff] %vm1468_vm7, %v1379_v15  ;;  %v1602_v25 = vpop.permute.xlu0 %1601  ;;  %v1704_v15 = vld [vmem:[#allocation2 + $0xe9] sm:$0xff] }
 0x182   : > { %1226 = vrot.lane.b32.xlu1 %v1716_v52, %s2914_s23  ;;  %1680 = vst.msk [vmem:[#allocation3 + $0x90] sm:$0xff] %vm1661_vm8, %v1602_v25 }
 0x183   : > { %1196 = vrot.lane.b32.xlu0 %v1701_v10, %s2914_s23 }
 0x184   : > { %v1570_v38 = vpop.permute.xlu1 %1569 }
 0x185   : > { %1664 = vst.msk [vmem:[#allocation3 + $0x10] sm:$0xff] %vm1661_vm8, %v1570_v38  ;;  %v994_v42 = vpop.permute.xlu0 %993 }
 0x186   : > { %1804 = vrot.lane.b32.xlu1 %v1717_v56, %s2917_s7  ;;  %1086 = vst.msk [vmem:[#allocation3 + $0x20] sm:$0xff] %vm1081_vm5, %v994_v42 }
 0x187   : > { %1388 = vrot.lane.b32.xlu0 %v1316_v13, %s2915_s24 }
 0x188   : > { %v835_v21 = vpop.permute.xlu1 %834 }
 0x189   : > { %910 = vst.msk [vmem:[#allocation3 + $0xa8] sm:$0xff] %vm888_vm4, %v835_v21  ;;  %v1572_v27 = vpop.permute.xlu0 %1571  ;;  %v1720_v21 = vld [vmem:[#allocation2 + $0x1e9] sm:$0xff] }
 0x18a   : > { %1228 = vrot.lane.b32.xlu1 %v1717_v56, %s2914_s23  ;;  %1665 = vst.msk [vmem:[#allocation3 + $0x18] sm:$0xff] %vm1661_vm8, %v1572_v27  ;;  %v1528_v56 = vld [vmem:[#allocation2 + $0x1f0] sm:$0xff] }
 0x18b   : > { %844 = vrot.lane.b32.xlu0 %v4064_v36, %s2912_s21 }
 0x18c   : > { %v1026_v45 = vpop.permute.xlu1 %1025 }
 0x18d   : > { %1102 = vst.msk [vmem:[#allocation3 + $0xa0] sm:$0xff] %vm1081_vm5, %v1026_v45  ;;  %v1763_v32 = vpop.permute.xlu0 %1762 }
 0x18e   : > { %1420 = vrot.lane.b32.xlu1 %v4064_v36, %s2915_s24  ;;  %1857 = vst.msk [vmem:[#allocation3 + $0x10] sm:$0xff] %vm1854_vm9, %v1763_v32 }
 0x18f   : > { %1422 = vrot.lane.b32.xlu0 %v4065_v50, %s2915_s24 }
 0x190   : > { %v1604_v37 = vpop.permute.xlu1 %1603 }
 0x191   : > { %1681 = vst.msk [vmem:[#allocation3 + $0x98] sm:$0xff] %vm1661_vm8, %v1604_v37  ;;  %v996_v9 = vpop.permute.xlu0 %995 }
 0x192   : > { %1390 = vrot.lane.b32.xlu1 %v1317_v55, %s2915_s24  ;;  %1087 = vst.msk [vmem:[#allocation3 + $0x28] sm:$0xff] %vm1081_vm5, %v996_v9  ;;  %v1705_v55 = vld [vmem:[#allocation2 + $0xf1] sm:$0xff] }
 0x193   : > { %1613 = vrot.lane.b32.xlu0 %v1525_v35, %s2916_s25  ;;  %v1721_v9 = vld [vmem:[#allocation2 + $0x1f1] sm:$0xff] }
 0x194   : > { %v1795_v59 = vpop.permute.xlu1 %1794 }
 0x195   : > { %1873 = vst.msk [vmem:[#allocation3 + $0x90] sm:$0xff] %vm1854_vm9, %v1795_v59  ;;  %v1187_v5 = vpop.permute.xlu0 %1186  ;;  %v1889_v49 = vld [vmem:[#allocation3 + $0x10] sm:$0xff]  ;;  %v1320_v59 = vld [vmem:[#allocation2 + $0x107] sm:$0xff] }
 0x196   : > { %1581 = vrot.lane.b32.xlu1 %v1509_v41, %s2916_s25  ;;  %1279 = vst.msk [vmem:[#allocation3 + $0x20] sm:$0xff] %vm1274_vm6, %v1187_v5  ;;  %2697 = vmatprep.mubr.msk.f32.mxu0 %vm1931_vm10, %v1889_v49 }
 0x197   : > { %1005 = vrot.lane.b32.xlu0 %v1509_v41, %s2913_s22 }
 0x198   : > { %v1028_v8 = vpop.permute.xlu1 %1027 }
 0x199   : > { %1103 = vst.msk [vmem:[#allocation3 + $0xa8] sm:$0xff] %vm1081_vm5, %v1028_v8  ;;  %v1765_v14 = vpop.permute.xlu0 %1764  ;;  %v758_v8 = vld [vmem:[#allocation2 + $0x207] sm:$0xff] }
 0x19a   : > { %846 = vrot.lane.b32.xlu1 %v4065_v50, %s2912_s21  ;;  %1858 = vst.msk [vmem:[#allocation3 + $0x18] sm:$0xff] %vm1854_vm9, %v1765_v14 }
 0x19b   : > { %1583 = vrot.lane.b32.xlu0 %v1510_v54, %s2916_s25 }
 0x19c   : > { %v1219_v51 = vpop.permute.xlu1 %1218  ;;  %v1905_v19 = vld [vmem:[#allocation3 + $0x90] sm:$0xff] }
 0x19d   : > { %1295 = vst.msk [vmem:[#allocation3 + $0xa0] sm:$0xff] %vm1274_vm6, %v1219_v51  ;;  %2721 = vmatprep.mubr.msk.f32.mxu1 %vm1931_vm10, %v1905_v19  ;;  %v1189_v63 = vpop.permute.xlu0 %1188  ;;  %v1337_v51 = vld [vmem:[#allocation2 + $0x20f] sm:$0xff] }
 0x19e   : > { %1037 = vrot.lane.b32.xlu1 %v1525_v35, %s2913_s22  ;;  %1280 = vst.msk [vmem:[#allocation3 + $0x28] sm:$0xff] %vm1274_vm6, %v1189_v63 }
 0x19f   : > { %1774 = vrot.lane.b32.xlu0 %v1702_v53, %s2917_s7 }
 0x1a0   : > { %v1797_v11 = vpop.permute.xlu1 %1796 }
 0x1a1   : > { %1874 = vst.msk [vmem:[#allocation3 + $0x98] sm:$0xff] %vm1854_vm9, %v1797_v11  ;;  %v1381_v26 = vpop.permute.xlu0 %1380  ;;  %v1890_v44 = vld [vmem:[#allocation3 + $0x18] sm:$0xff] }
 0x1a2   : > { %1615 = vrot.lane.b32.xlu1 %v1526_v24, %s2916_s25  ;;  %1473 = vst.msk [vmem:[#allocation3 + $0x20] sm:$0xff] %vm1468_vm7, %v1381_v26  ;;  %2698 = vmatmul.mubr.msk.f32.gmra.mrb[2].mxu0 %vm1931_vm10, %v1890_v44  ;;  %v1513_v26 = vld [vmem:[#allocation2 + $0x108] sm:$0xff] }
 0x1a3   : > { %1007 = vrot.lane.b32.xlu0 %v1510_v54, %s2913_s22 }
 0x1a4   : > { %v1221_v28 = vpop.permute.xlu1 %1220 }
 0x1a5   : > { %1296 = vst.msk [vmem:[#allocation3 + $0xa8] sm:$0xff] %vm1274_vm6, %v1221_v28  ;;  %v837_v46 = vpop.permute.xlu0 %836 }
 0x1a6   : > { %1806 = vrot.lane.b32.xlu1 %v1718_v23, %s2917_s7  ;;  %911 = vst.msk [vmem:[#allocation3 + $0xb0] sm:$0xff] %vm888_vm4, %v837_v46 }
 0x1a7   : > { %1198 = vrot.lane.b32.xlu0 %v1702_v53, %s2914_s23  ;;  %v1321_v53 = vld [vmem:[#allocation2 + $0x10f] sm:$0xff] }
 0x1a8   : > { %v1413_v47 = vpop.permute.xlu1 %1412  ;;  %v1906_v16 = vld [vmem:[#allocation3 + $0x98] sm:$0xff] }
 0x1a9   : > { %1489 = vst.msk [vmem:[#allocation3 + $0xa0] sm:$0xff] %vm1468_vm7, %v1413_v47  ;;  %2722 = vmatmul.mubr.msk.f32.gmra.mrb[2].mxu1 %vm1931_vm10, %v1906_v16  ;;  %v1415_v58 = vpop.permute.xlu0 %1414  ;;  %v1514_v47 = vld [vmem:[#allocation2 + $0x110] sm:$0xff] }
 0x1aa   : > { %1039 = vrot.lane.b32.xlu1 %v1526_v24, %s2913_s22  ;;  %1490 = vst.msk [vmem:[#allocation3 + $0xa8] sm:$0xff] %vm1468_vm7, %v1415_v58  ;;  %v1529_v24 = vld [vmem:[#allocation2 + $0x208] sm:$0xff] }
 0x1ab   : > { %1776 = vrot.lane.b32.xlu0 %v1703_v22, %s2917_s7 }
 0x1ac   : > { %v1383_v60 = vpop.permute.xlu1 %1382 }
 0x1ad   : > { %1474 = vst.msk [vmem:[#allocation3 + $0x28] sm:$0xff] %vm1468_vm7, %v1383_v60  ;;  %v1606_v20 = vpop.permute.xlu0 %1605  ;;  %v1706_v60 = vld [vmem:[#allocation2 + $0x109] sm:$0xff] }
 0x1ae   : > { %1230 = vrot.lane.b32.xlu1 %v1718_v23, %s2914_s23  ;;  %1682 = vst.msk [vmem:[#allocation3 + $0xa0] sm:$0xff] %vm1661_vm8, %v1606_v20 }
 0x1af   : > { %1200 = vrot.lane.b32.xlu0 %v1703_v22, %s2914_s23 }
 0x1b0   : > { %v1574_v62 = vpop.permute.xlu1 %1573 }
 0x1b1   : > { %1666 = vst.msk [vmem:[#allocation3 + $0x20] sm:$0xff] %vm1661_vm8, %v1574_v62  ;;  %v998_v12 = vpop.permute.xlu0 %997 }
 0x1b2   : > { %1808 = vrot.lane.b32.xlu1 %v1719_v18, %s2917_s7  ;;  %1088 = vst.msk [vmem:[#allocation3 + $0x30] sm:$0xff] %vm1081_vm5, %v998_v12 }
 0x1b3   : > { %1392 = vrot.lane.b32.xlu0 %v1318_v0, %s2915_s24 }
 0x1b4   : > { %v839_v17 = vpop.permute.xlu1 %838 }
 0x1b5   : > { %912 = vst.msk [vmem:[#allocation3 + $0xb8] sm:$0xff] %vm888_vm4, %v839_v17  ;;  %v1576_v31 = vpop.permute.xlu0 %1575  ;;  %v1722_v17 = vld [vmem:[#allocation2 + $0x209] sm:$0xff] }
 0x1b6   : > { %1232 = vrot.lane.b32.xlu1 %v1719_v18, %s2914_s23  ;;  %1667 = vst.msk [vmem:[#allocation3 + $0x28] sm:$0xff] %vm1661_vm8, %v1576_v31  ;;  %v1530_v18 = vld [vmem:[#allocation2 + $0x210] sm:$0xff] }
 0x1b7   : > { %848 = vrot.lane.b32.xlu0 %v756_v1, %s2912_s21 }
 0x1b8   : > { %v1030_v61 = vpop.permute.xlu1 %1029 }
 0x1b9   : > { %1104 = vst.msk [vmem:[#allocation3 + $0xb0] sm:$0xff] %vm1081_vm5, %v1030_v61  ;;  %v1767_v2 = vpop.permute.xlu0 %1766 }
 0x1ba   : > { %1424 = vrot.lane.b32.xlu1 %v756_v1, %s2915_s24  ;;  %1859 = vst.msk [vmem:[#allocation3 + $0x20] sm:$0xff] %vm1854_vm9, %v1767_v2 }
 0x1bb   : > { %1426 = vrot.lane.b32.xlu0 %v4066_v40, %s2915_s24 }
 0x1bc   : > { %v1608_v3 = vpop.permute.xlu1 %1607 }
 0x1bd   : > { %1683 = vst.msk [vmem:[#allocation3 + $0xa8] sm:$0xff] %vm1661_vm8, %v1608_v3  ;;  %v1000_v39 = vpop.permute.xlu0 %999 }
 0x1be   : > { %1394 = vrot.lane.b32.xlu1 %v1319_v34, %s2915_s24  ;;  %1089 = vst.msk [vmem:[#allocation3 + $0x38] sm:$0xff] %vm1081_vm5, %v1000_v39  ;;  %v1707_v34 = vld [vmem:[#allocation2 + $0x111] sm:$0xff] }
 0x1bf   : > { %1617 = vrot.lane.b32.xlu0 %v1527_v4, %s2916_s25  ;;  %v1723_v39 = vld [vmem:[#allocation2 + $0x211] sm:$0xff] }
 0x1c0   : > { %v1799_v7 = vpop.permute.xlu1 %1798 }
 0x1c1   : > { %1875 = vst.msk [vmem:[#allocation3 + $0xa0] sm:$0xff] %vm1854_vm9, %v1799_v7  ;;  %v1191_v52 = vpop.permute.xlu0 %1190  ;;  %v1891_v48 = vld [vmem:[#allocation3 + $0x20] sm:$0xff] }
 0x1c2   : > { %1585 = vrot.lane.b32.xlu1 %v1511_v43, %s2916_s25  ;;  %1281 = vst.msk [vmem:[#allocation3 + $0x30] sm:$0xff] %vm1274_vm6, %v1191_v52  ;;  %2700 = vmatprep.mubr.msk.f32.mxu0 %vm1931_vm10, %v1891_v48  ;;  %v1322_v7 = vld [vmem:[#allocation2 + $0x127] sm:$0xff] }
 0x1c3   : > { %1009 = vrot.lane.b32.xlu0 %v1511_v43, %s2913_s22 }
 0x1c4   : > { %v1032_v6 = vpop.permute.xlu1 %1031 }
 0x1c5   : > { %1105 = vst.msk [vmem:[#allocation3 + $0xb8] sm:$0xff] %vm1081_vm5, %v1032_v6  ;;  %v1769_v30 = vpop.permute.xlu0 %1768 }
 0x1c6   : > { %850 = vrot.lane.b32.xlu1 %v757_v57, %s2912_s21  ;;  %1860 = vst.msk [vmem:[#allocation3 + $0x28] sm:$0xff] %vm1854_vm9, %v1769_v30  ;;  %v1323_v57 = vld [vmem:[#allocation2 + $0x12f] sm:$0xff] }
 0x1c7   : > { %1587 = vrot.lane.b32.xlu0 %v1512_v29, %s2916_s25 }
 0x1c8   : > { %v1223_v10 = vpop.permute.xlu1 %1222  ;;  %v1907_v33 = vld [vmem:[#allocation3 + $0xa0] sm:$0xff] }
 0x1c9   : > { %1297 = vst.msk [vmem:[#allocation3 + $0xb0] sm:$0xff] %vm1274_vm6, %v1223_v10  ;;  %2724 = vmatprep.mubr.msk.f32.mxu1 %vm1931_vm10, %v1907_v33  ;;  %v1193_v25 = vpop.permute.xlu0 %1192  ;;  %v1515_v10 = vld [vmem:[#allocation2 + $0x128] sm:$0xff] }
 0x1ca   : > { %1041 = vrot.lane.b32.xlu1 %v1527_v4, %s2913_s22  ;;  %1282 = vst.msk [vmem:[#allocation3 + $0x38] sm:$0xff] %vm1274_vm6, %v1193_v25 }
 0x1cb   : > { %1778 = vrot.lane.b32.xlu0 %v1704_v15, %s2917_s7 }
 0x1cc   : > { %v1801_v38 = vpop.permute.xlu1 %1800 }
 0x1cd   : > { %1876 = vst.msk [vmem:[#allocation3 + $0xa8] sm:$0xff] %vm1854_vm9, %v1801_v38  ;;  %v1385_v13 = vpop.permute.xlu0 %1384  ;;  %v1892_v42 = vld [vmem:[#allocation3 + $0x28] sm:$0xff] }
 0x1ce   : > { %1619 = vrot.lane.b32.xlu1 %v1528_v56, %s2916_s25  ;;  %1475 = vst.msk [vmem:[#allocation3 + $0x30] sm:$0xff] %vm1468_vm7, %v1385_v13  ;;  %2701 = vmatmul.mubr.msk.f32.gmra.mrb[4].mxu0 %vm1931_vm10, %v1892_v42  ;;  %v1531_v13 = vld [vmem:[#allocation2 + $0x228] sm:$0xff] }
 0x1cf   : > { %1011 = vrot.lane.b32.xlu0 %v1512_v29, %s2913_s22  ;;  %v1338_v29 = vld [vmem:[#allocation2 + $0x227] sm:$0xff] }
 0x1d0   : > { %v1225_v27 = vpop.permute.xlu1 %1224 }
 0x1d1   : > { %1298 = vst.msk [vmem:[#allocation3 + $0xb8] sm:$0xff] %vm1274_vm6, %v1225_v27  ;;  %v841_v36 = vpop.permute.xlu0 %840 }
 0x1d2   : > { %1810 = vrot.lane.b32.xlu1 %v1720_v21, %s2917_s7  ;;  %913 = vst.msk [vmem:[#allocation3 + $0xc0] sm:$0xff] %vm888_vm4, %v841_v36 }
 0x1d3   : > { %1202 = vrot.lane.b32.xlu0 %v1704_v15, %s2914_s23  ;;  %v1339_v15 = vld [vmem:[#allocation2 + $0x22f] sm:$0xff] }
 0x1d4   : > { %v1417_v45 = vpop.permute.xlu1 %1416  ;;  %v1908_v32 = vld [vmem:[#allocation3 + $0xa8] sm:$0xff] }
 0x1d5   : > { %1491 = vst.msk [vmem:[#allocation3 + $0xb0] sm:$0xff] %vm1468_vm7, %v1417_v45  ;;  %2725 = vmatmul.mubr.msk.f32.gmra.mrb[4].mxu1 %vm1931_vm10, %v1908_v32  ;;  %v1419_v50 = vpop.permute.xlu0 %1418  ;;  %v1532_v45 = vld [vmem:[#allocation2 + $0x230] sm:$0xff] }
 0x1d6   : > { %1043 = vrot.lane.b32.xlu1 %v1528_v56, %s2913_s22  ;;  %1492 = vst.msk [vmem:[#allocation3 + $0xb8] sm:$0xff] %vm1468_vm7, %v1419_v50  ;;  %v1516_v56 = vld [vmem:[#allocation2 + $0x130] sm:$0xff] }
 0x1d7   : > { %1780 = vrot.lane.b32.xlu0 %v1705_v55, %s2917_s7 }
 0x1d8   : > { %v1387_v37 = vpop.permute.xlu1 %1386 }
 0x1d9   : > { %1476 = vst.msk [vmem:[#allocation3 + $0x38] sm:$0xff] %vm1468_vm7, %v1387_v37  ;;  %v1610_v35 = vpop.permute.xlu0 %1609  ;;  %v1724_v37 = vld [vmem:[#allocation2 + $0x229] sm:$0xff] }
 0x1da   : > { %1234 = vrot.lane.b32.xlu1 %v1720_v21, %s2914_s23  ;;  %1684 = vst.msk [vmem:[#allocation3 + $0xb0] sm:$0xff] %vm1661_vm8, %v1610_v35  ;;  %v1708_v21 = vld [vmem:[#allocation2 + $0x129] sm:$0xff] }
 0x1db   : > { %1204 = vrot.lane.b32.xlu0 %v1705_v55, %s2914_s23  ;;  %v1709_v55 = vld [vmem:[#allocation2 + $0x131] sm:$0xff] }
 0x1dc   : > { %v1578_v41 = vpop.permute.xlu1 %1577 }
 0x1dd   : > { %1668 = vst.msk [vmem:[#allocation3 + $0x30] sm:$0xff] %vm1661_vm8, %v1578_v41  ;;  %v1002_v5 = vpop.permute.xlu0 %1001 }
 0x1de   : > { %1812 = vrot.lane.b32.xlu1 %v1721_v9, %s2917_s7  ;;  %1090 = vst.msk [vmem:[#allocation3 + $0x40] sm:$0xff] %vm1081_vm5, %v1002_v5 }
 0x1df   : > { %1396 = vrot.lane.b32.xlu0 %v1320_v59, %s2915_s24  ;;  %v1725_v59 = vld [vmem:[#allocation2 + $0x231] sm:$0xff] }
 0x1e0   : > { %v843_v49 = vpop.permute.xlu1 %842 }
 0x1e1   : > { %914 = vst.msk [vmem:[#allocation3 + $0xc8] sm:$0xff] %vm888_vm4, %v843_v49  ;;  %v1580_v54 = vpop.permute.xlu0 %1579 }
 0x1e2   : > { %1236 = vrot.lane.b32.xlu1 %v1721_v9, %s2914_s23  ;;  %1669 = vst.msk [vmem:[#allocation3 + $0x38] sm:$0xff] %vm1661_vm8, %v1580_v54 }
 0x1e3   : > { %852 = vrot.lane.b32.xlu0 %v758_v8, %s2912_s21 }
 0x1e4   : > { %v1034_v14 = vpop.permute.xlu1 %1033 }
 0x1e5   : > { %1106 = vst.msk [vmem:[#allocation3 + $0xc0] sm:$0xff] %vm1081_vm5, %v1034_v14  ;;  %v1771_v19 = vpop.permute.xlu0 %1770 }
 0x1e6   : > { %1428 = vrot.lane.b32.xlu1 %v758_v8, %s2915_s24  ;;  %1861 = vst.msk [vmem:[#allocation3 + $0x30] sm:$0xff] %vm1854_vm9, %v1771_v19 }
 0x1e7   : > { %1430 = vrot.lane.b32.xlu0 %v1337_v51, %s2915_s24 }
 0x1e8   : > { %v1612_v63 = vpop.permute.xlu1 %1611 }
 0x1e9   : > { %1685 = vst.msk [vmem:[#allocation3 + $0xb8] sm:$0xff] %vm1661_vm8, %v1612_v63  ;;  %v1004_v11 = vpop.permute.xlu0 %1003 }
 0x1ea   : > { %1398 = vrot.lane.b32.xlu1 %v1321_v53, %s2915_s24  ;;  %1091 = vst.msk [vmem:[#allocation3 + $0x48] sm:$0xff] %vm1081_vm5, %v1004_v11 }
 0x1eb   : > { %1621 = vrot.lane.b32.xlu0 %v1529_v24, %s2916_s25 }
 0x1ec   : > { %v1803_v44 = vpop.permute.xlu1 %1802 }
 0x1ed   : > { %1877 = vst.msk [vmem:[#allocation3 + $0xb0] sm:$0xff] %vm1854_vm9, %v1803_v44  ;;  %v1195_v23 = vpop.permute.xlu0 %1194  ;;  %v1893_v28 = vld [vmem:[#allocation3 + $0x30] sm:$0xff] }
 0x1ee   : > { %1589 = vrot.lane.b32.xlu1 %v1513_v26, %s2916_s25  ;;  %1283 = vst.msk [vmem:[#allocation3 + $0x40] sm:$0xff] %vm1274_vm6, %v1195_v23  ;;  %2703 = vmatprep.mubr.msk.f32.mxu0 %vm1931_vm10, %v1893_v28 }
 0x1ef   : > { %1013 = vrot.lane.b32.xlu0 %v1513_v26, %s2913_s22 }
 0x1f0   : > { %v1036_v46 = vpop.permute.xlu1 %1035 }
 0x1f1   : > { %1107 = vst.msk [vmem:[#allocation3 + $0xc8] sm:$0xff] %vm1081_vm5, %v1036_v46  ;;  %v1773_v16 = vpop.permute.xlu0 %1772 }
 0x1f2   : > { %854 = vrot.lane.b32.xlu1 %v1337_v51, %s2912_s21  ;;  %1862 = vst.msk [vmem:[#allocation3 + $0x38] sm:$0xff] %vm1854_vm9, %v1773_v16 }
 0x1f3   : > { %1591 = vrot.lane.b32.xlu0 %v1514_v47, %s2916_s25 }
 0x1f4   : > { %v1227_v22 = vpop.permute.xlu1 %1226  ;;  %v1909_v58 = vld [vmem:[#allocation3 + $0xb0] sm:$0xff] }
 0x1f5   : > { %1299 = vst.msk [vmem:[#allocation3 + $0xc0] sm:$0xff] %vm1274_vm6, %v1227_v22  ;;  %2727 = vmatprep.mubr.msk.f32.mxu1 %vm1931_vm10, %v1909_v58  ;;  %v1197_v20 = vpop.permute.xlu0 %1196 }
 0x1f6   : > { %1045 = vrot.lane.b32.xlu1 %v1529_v24, %s2913_s22  ;;  %1284 = vst.msk [vmem:[#allocation3 + $0x48] sm:$0xff] %vm1274_vm6, %v1197_v20 }
 0x1f7   : > { %1782 = vrot.lane.b32.xlu0 %v1706_v60, %s2917_s7 }
 0x1f8   : > { %v1805_v62 = vpop.permute.xlu1 %1804 }
 0x1f9   : > { %1878 = vst.msk [vmem:[#allocation3 + $0xb8] sm:$0xff] %vm1854_vm9, %v1805_v62  ;;  %v1389_v0 = vpop.permute.xlu0 %1388  ;;  %v1894_v12 = vld [vmem:[#allocation3 + $0x38] sm:$0xff] }
 0x1fa   : > { %1623 = vrot.lane.b32.xlu1 %v1530_v18, %s2916_s25  ;;  %1477 = vst.msk [vmem:[#allocation3 + $0x40] sm:$0xff] %vm1468_vm7, %v1389_v0  ;;  %2704 = vmatmul.mubr.msk.f32.gmra.mrb[6].mxu0 %vm1931_vm10, %v1894_v12  ;;  %v3890_v12 = vld [vmem:[%s4049_s2] ss:$0 sm:$0xff] }
 0x1fb   : > { %1015 = vrot.lane.b32.xlu0 %v1514_v47, %s2913_s22 }
 0x1fc   : > { %v1229_v1 = vpop.permute.xlu1 %1228 }
 0x1fd   : > { %1300 = vst.msk [vmem:[#allocation3 + $0xc8] sm:$0xff] %vm1274_vm6, %v1229_v1  ;;  %v845_v31 = vpop.permute.xlu0 %844 }
 0x1fe   : > { %1814 = vrot.lane.b32.xlu1 %v1722_v17, %s2917_s7  ;;  %915 = vst.msk [vmem:[#allocation3 + $0xd0] sm:$0xff] %vm888_vm4, %v845_v31 }
 0x1ff   : > { %1206 = vrot.lane.b32.xlu0 %v1706_v60, %s2914_s23 }
 0x200   : > { %v1421_v61 = vpop.permute.xlu1 %1420  ;;  %v1910_v2 = vld [vmem:[#allocation3 + $0xb8] sm:$0xff] }
 0x201   : > { %1493 = vst.msk [vmem:[#allocation3 + $0xc0] sm:$0xff] %vm1468_vm7, %v1421_v61  ;;  %2728 = vmatmul.mubr.msk.f32.gmra.mrb[6].mxu1 %vm1931_vm10, %v1910_v2  ;;  %v1423_v40 = vpop.permute.xlu0 %1422 }
 0x202   : > { %1047 = vrot.lane.b32.xlu1 %v1530_v18, %s2913_s22  ;;  %1494 = vst.msk [vmem:[#allocation3 + $0xc8] sm:$0xff] %vm1468_vm7, %v1423_v40 }
 0x203   : > { %1784 = vrot.lane.b32.xlu0 %v1707_v34, %s2917_s7 }
 0x204   : > { %v1391_v3 = vpop.permute.xlu1 %1390 }
 0x205   : > { %1478 = vst.msk [vmem:[#allocation3 + $0x48] sm:$0xff] %vm1468_vm7, %v1391_v3  ;;  %v1614_v4 = vpop.permute.xlu0 %1613 }
 0x206   : > { %1238 = vrot.lane.b32.xlu1 %v1722_v17, %s2914_s23  ;;  %1686 = vst.msk [vmem:[#allocation3 + $0xc0] sm:$0xff] %vm1661_vm8, %v1614_v4 }
 0x207   : > { %1208 = vrot.lane.b32.xlu0 %v1707_v34, %s2914_s23 }
 0x208   : > { %v1582_v43 = vpop.permute.xlu1 %1581 }
 0x209   : > { %1670 = vst.msk [vmem:[#allocation3 + $0x40] sm:$0xff] %vm1661_vm8, %v1582_v43  ;;  %v1006_v52 = vpop.permute.xlu0 %1005 }
 0x20a   : > { %1816 = vrot.lane.b32.xlu1 %v1723_v39, %s2917_s7  ;;  %1092 = vst.msk [vmem:[#allocation3 + $0x50] sm:$0xff] %vm1081_vm5, %v1006_v52 }
 0x20b   : > { %1400 = vrot.lane.b32.xlu0 %v1322_v7, %s2915_s24 }
 0x20c   : > { %v847_v48 = vpop.permute.xlu1 %846 }
 0x20d   : > { %916 = vst.msk [vmem:[#allocation3 + $0xd8] sm:$0xff] %vm888_vm4, %v847_v48  ;;  %v1584_v6 = vpop.permute.xlu0 %1583 }
 0x20e   : > { %1240 = vrot.lane.b32.xlu1 %v1723_v39, %s2914_s23  ;;  %1671 = vst.msk [vmem:[#allocation3 + $0x48] sm:$0xff] %vm1661_vm8, %v1584_v6 }
 0x20f   : > { %1402 = vrot.lane.b32.xlu0 %v1323_v57, %s2915_s24 }
 0x210   : > { %v1038_v30 = vpop.permute.xlu1 %1037 }
 0x211   : > { %1108 = vst.msk [vmem:[#allocation3 + $0xd0] sm:$0xff] %vm1081_vm5, %v1038_v30  ;;  %v1775_v33 = vpop.permute.xlu0 %1774 }
 0x212   : > { %1432 = vrot.lane.b32.xlu1 %v1338_v29, %s2915_s24  ;;  %1863 = vst.msk [vmem:[#allocation3 + $0x40] sm:$0xff] %vm1854_vm9, %v1775_v33 }
 0x213   : > { %1593 = vrot.lane.b32.xlu0 %v1515_v10, %s2916_s25 }
 0x214   : > { %v1616_v25 = vpop.permute.xlu1 %1615 }
 0x215   : > { %1687 = vst.msk [vmem:[#allocation3 + $0xc8] sm:$0xff] %vm1661_vm8, %v1616_v25  ;;  %v1008_v38 = vpop.permute.xlu0 %1007 }
 0x216   : > { %1434 = vrot.lane.b32.xlu1 %v1339_v15, %s2915_s24  ;;  %1093 = vst.msk [vmem:[#allocation3 + $0x58] sm:$0xff] %vm1081_vm5, %v1008_v38 }
 0x217   : > { %1595 = vrot.lane.b32.xlu0 %v1516_v56, %s2916_s25 }
 0x218   : > { %v1807_v42 = vpop.permute.xlu1 %1806 }
 0x219   : > { %1879 = vst.msk [vmem:[#allocation3 + $0xc0] sm:$0xff] %vm1854_vm9, %v1807_v42  ;;  %v1199_v27 = vpop.permute.xlu0 %1198  ;;  %v1895_v36 = vld [vmem:[#allocation3 + $0x40] sm:$0xff] }
 0x21a   : > { %1625 = vrot.lane.b32.xlu1 %v1531_v13, %s2916_s25  ;;  %1285 = vst.msk [vmem:[#allocation3 + $0x50] sm:$0xff] %vm1274_vm6, %v1199_v27  ;;  %2706 = vmatprep.mubr.msk.f32.mxu0 %vm1931_vm10, %v1895_v36 }
 0x21b   : > { %1786 = vrot.lane.b32.xlu0 %v1708_v21, %s2917_s7 }
 0x21c   : > { %v1040_v32 = vpop.permute.xlu1 %1039 }
 0x21d   : > { %1109 = vst.msk [vmem:[#allocation3 + $0xd8] sm:$0xff] %vm1081_vm5, %v1040_v32  ;;  %v1777_v50 = vpop.permute.xlu0 %1776 }
 0x21e   : > { %1627 = vrot.lane.b32.xlu1 %v1532_v45, %s2916_s25  ;;  %1864 = vst.msk [vmem:[#allocation3 + $0x48] sm:$0xff] %vm1854_vm9, %v1777_v50 }
 0x21f   : > { %1788 = vrot.lane.b32.xlu0 %v1709_v55, %s2917_s7 }
 0x220   : > { %v1231_v35 = vpop.permute.xlu1 %1230  ;;  %v1911_v9 = vld [vmem:[#allocation3 + $0xc0] sm:$0xff] }
 0x221   : > { %1301 = vst.msk [vmem:[#allocation3 + $0xd0] sm:$0xff] %vm1274_vm6, %v1231_v35  ;;  %2730 = vmatprep.mubr.msk.f32.mxu1 %vm1931_vm10, %v1911_v9  ;;  %v1201_v41 = vpop.permute.xlu0 %1200 }
 0x222   : > { %1818 = vrot.lane.b32.xlu1 %v1724_v37, %s2917_s7  ;;  %1286 = vst.msk [vmem:[#allocation3 + $0x58] sm:$0xff] %vm1274_vm6, %v1201_v41 }
 0x224   : > { %v1809_v5 = vpop.permute.xlu1 %1808 }
 0x225   : > { %1880 = vst.msk [vmem:[#allocation3 + $0xc8] sm:$0xff] %vm1854_vm9, %v1809_v5  ;;  %v1393_v49 = vpop.permute.xlu0 %1392  ;;  %v1896_v8 = vld [vmem:[#allocation3 + $0x48] sm:$0xff] }
 0x226   : > { %1820 = vrot.lane.b32.xlu1 %v1725_v59, %s2917_s7  ;;  %1479 = vst.msk [vmem:[#allocation3 + $0x50] sm:$0xff] %vm1468_vm7, %v1393_v49  ;;  %2707 = vmatmul.mubr.msk.f32.gmra.mrb[8].mxu0 %vm1931_vm10, %v1896_v8 }
 0x228   : > { %v1233_v54 = vpop.permute.xlu1 %1232 }
 0x229   : > { %1302 = vst.msk [vmem:[#allocation3 + $0xd8] sm:$0xff] %vm1274_vm6, %v1233_v54  ;;  %v849_v14 = vpop.permute.xlu0 %848 }
 0x22a   : > { %917 = vst.msk [vmem:[#allocation3 + $0xe0] sm:$0xff] %vm888_vm4, %v849_v14 }
 0x22c   : > { %v1425_v51 = vpop.permute.xlu1 %1424  ;;  %v1912_v19 = vld [vmem:[#allocation3 + $0xc8] sm:$0xff] }
 0x22d   : > { %1495 = vst.msk [vmem:[#allocation3 + $0xd0] sm:$0xff] %vm1468_vm7, %v1425_v51  ;;  %2731 = vmatmul.mubr.msk.f32.gmra.mrb[8].mxu1 %vm1931_vm10, %v1912_v19  ;;  %v1427_v53 = vpop.permute.xlu0 %1426 }
 0x22e   : > { %1496 = vst.msk [vmem:[#allocation3 + $0xd8] sm:$0xff] %vm1468_vm7, %v1427_v53 }
 0x230   : > { %v1395_v63 = vpop.permute.xlu1 %1394 }
 0x231   : > { %1480 = vst.msk [vmem:[#allocation3 + $0x58] sm:$0xff] %vm1468_vm7, %v1395_v63  ;;  %v1618_v24 = vpop.permute.xlu0 %1617 }
 0x232   : > { %1688 = vst.msk [vmem:[#allocation3 + $0xd0] sm:$0xff] %vm1661_vm8, %v1618_v24 }
 0x234   : > { %v1586_v11 = vpop.permute.xlu1 %1585 }
 0x235   : > { %1672 = vst.msk [vmem:[#allocation3 + $0x50] sm:$0xff] %vm1661_vm8, %v1586_v11  ;;  %v1010_v26 = vpop.permute.xlu0 %1009 }
 0x236   : > { %1094 = vst.msk [vmem:[#allocation3 + $0x60] sm:$0xff] %vm1081_vm5, %v1010_v26 }
 0x238   : > { %v851_v44 = vpop.permute.xlu1 %850 }
 0x239   : > { %918 = vst.msk [vmem:[#allocation3 + $0xe8] sm:$0xff] %vm888_vm4, %v851_v44  ;;  %v1588_v23 = vpop.permute.xlu0 %1587 }
 0x23a   : > { %1673 = vst.msk [vmem:[#allocation3 + $0x58] sm:$0xff] %vm1661_vm8, %v1588_v23 }
 0x23c   : > { %v1042_v28 = vpop.permute.xlu1 %1041 }
 0x23d   : > { %1110 = vst.msk [vmem:[#allocation3 + $0xe0] sm:$0xff] %vm1081_vm5, %v1042_v28  ;;  %v1779_v46 = vpop.permute.xlu0 %1778 }
 0x23e   : > { %1865 = vst.msk [vmem:[#allocation3 + $0x50] sm:$0xff] %vm1854_vm9, %v1779_v46 }
 0x240   : > { %v1620_v47 = vpop.permute.xlu1 %1619 }
 0x241   : > { %1689 = vst.msk [vmem:[#allocation3 + $0xd8] sm:$0xff] %vm1661_vm8, %v1620_v47  ;;  %v1012_v16 = vpop.permute.xlu0 %1011 }
 0x242   : > { %1095 = vst.msk [vmem:[#allocation3 + $0x68] sm:$0xff] %vm1081_vm5, %v1012_v16 }
 0x244   : > { %v1811_v22 = vpop.permute.xlu1 %1810 }
 0x245   : > { %1881 = vst.msk [vmem:[#allocation3 + $0xd0] sm:$0xff] %vm1854_vm9, %v1811_v22  ;;  %v1203_v58 = vpop.permute.xlu0 %1202  ;;  %v1897_v60 = vld [vmem:[#allocation3 + $0x50] sm:$0xff] }
 0x246   : > { %1287 = vst.msk [vmem:[#allocation3 + $0x60] sm:$0xff] %vm1274_vm6, %v1203_v58  ;;  %2709 = vmatprep.mubr.msk.f32.mxu0 %vm1931_vm10, %v1897_v60 }
 0x248   : > { %v1044_v20 = vpop.permute.xlu1 %1043 }
 0x249   : > { %1111 = vst.msk [vmem:[#allocation3 + $0xe8] sm:$0xff] %vm1081_vm5, %v1044_v20  ;;  %v1781_v18 = vpop.permute.xlu0 %1780 }
 0x24a   : > { %1866 = vst.msk [vmem:[#allocation3 + $0x58] sm:$0xff] %vm1854_vm9, %v1781_v18 }
 0x24c   : > { %v1235_v62 = vpop.permute.xlu1 %1234  ;;  %v1913_v0 = vld [vmem:[#allocation3 + $0xd0] sm:$0xff] }
 0x24d   : > { %1303 = vst.msk [vmem:[#allocation3 + $0xe0] sm:$0xff] %vm1274_vm6, %v1235_v62  ;;  %2733 = vmatprep.mubr.msk.f32.mxu1 %vm1931_vm10, %v1913_v0  ;;  %v1205_v17 = vpop.permute.xlu0 %1204  ;;  %v2720_v1 = vpop.f32.mrb[0].mxu1 }
 0x24e   : > { %1288 = vst.msk [vmem:[#allocation3 + $0x68] sm:$0xff] %vm1274_vm6, %v1205_v17  ;;  %v2184_v31 = vadd.f32 %v2720_v1, %v3890_v12  ;;  %v2178_v61 = vpop.f32.mrb[1].mxu1 }
 0x24f   : > { %v2179_v2 = vadd.f32 %v3890_v12, %v2178_v61 }
 0x250   : > { %v2696_v34 = vpop.f32.mrb[0].mxu0  ;;  %v1813_v40 = vpop.permute.xlu1 %1812  ;;  %v2628_v3 = vmul.f32 -1.442695, %v2184_v31 }
 0x251   : > { %v2104_v4 = vadd.f32 %v2696_v34, %v3890_v12  ;;  %1882 = vst.msk [vmem:[#allocation3 + $0xd8] sm:$0xff] %vm1854_vm9, %v1813_v40  ;;  %v2098_v39 = vpop.f32.mrb[1].mxu0  ;;  %v2627_v43 = vmul.f32 -1.442695, %v2179_v2  ;;  %v1397_v52 = vpop.permute.xlu0 %1396  ;;  %v1898_v48 = vld [vmem:[#allocation3 + $0x58] sm:$0xff] }
 0x252   : > { %v2099_v7 = vadd.f32 %v3890_v12, %v2098_v39  ;;  %2773 = vpow2.f32 %v2628_v3  ;;  %1481 = vst.msk [vmem:[#allocation3 + $0x60] sm:$0xff] %vm1468_vm7, %v1397_v52  ;;  %2710 = vmatmul.mubr.msk.f32.gmra.mrb[10].mxu0 %vm1931_vm10, %v1898_v48 }
 0x253   : > { %v2612_v57 = vmul.f32 -1.442695, %v2104_v4  ;;  %2775 = vpow2.f32 %v2627_v43 }
 0x254   : > { %v2611_v6 = vmul.f32 -1.442695, %v2099_v7  ;;  %v1237_v29 = vpop.permute.xlu1 %1236 }
 0x255   : > { %2777 = vpow2.f32 %v2612_v57  ;;  %1304 = vst.msk [vmem:[#allocation3 + $0xe8] sm:$0xff] %vm1274_vm6, %v1237_v29  ;;  %v853_v30 = vpop.permute.xlu0 %852 }
 0x256   : > { %2779 = vpow2.f32 %v2611_v6  ;;  %919 = vst.msk [vmem:[#allocation3 + $0xf0] sm:$0xff] %vm888_vm4, %v853_v30 }
 0x258   : > { %v1429_v10 = vpop.permute.xlu1 %1428  ;;  %v1914_v33 = vld [vmem:[#allocation3 + $0xd8] sm:$0xff] }
 0x259   : > { %1497 = vst.msk [vmem:[#allocation3 + $0xe0] sm:$0xff] %vm1468_vm7, %v1429_v10  ;;  %2734 = vmatmul.mubr.msk.f32.gmra.mrb[10].mxu1 %vm1931_vm10, %v1914_v33  ;;  %v1431_v15 = vpop.permute.xlu0 %1430 }
 0x25a   : > { %1498 = vst.msk [vmem:[#allocation3 + $0xe8] sm:$0xff] %vm1468_vm7, %v1431_v15 }
 0x25c   : > { %v1399_v25 = vpop.permute.xlu1 %1398  ;;  %v2774_v56 = vpop.eup %2773 }
 0x25d   : > { %1482 = vst.msk [vmem:[#allocation3 + $0x68] sm:$0xff] %vm1468_vm7, %v1399_v25  ;;  %v2776_v38 = vpop.eup %2775  ;;  %v2370_v13 = vadd.f32 1.0, %v2774_v56  ;;  %v1622_v42 = vpop.permute.xlu0 %1621 }
 0x25e   : > { %v2369_v27 = vadd.f32 1.0, %v2776_v38  ;;  %1690 = vst.msk [vmem:[#allocation3 + $0xe0] sm:$0xff] %vm1661_vm8, %v1622_v42 }
 0x25f   : > { %v2778_v21 = vpop.eup %2777  ;;  %2781 = vrcp.f32 %v2370_v13 }
 0x260   : > { %v2780_v36 = vpop.eup %2779  ;;  %v2354_v45 = vadd.f32 1.0, %v2778_v21  ;;  %v1590_v32 = vpop.permute.xlu1 %1589  ;;  %2783 = vrcp.f32 %v2369_v27 }
 0x261   : > { %v2353_v55 = vadd.f32 1.0, %v2780_v36  ;;  %1674 = vst.msk [vmem:[#allocation3 + $0x60] sm:$0xff] %vm1661_vm8, %v1590_v32  ;;  %v1014_v50 = vpop.permute.xlu0 %1013 }
 0x262   : > { %2785 = vrcp.f32 %v2354_v45  ;;  %1096 = vst.msk [vmem:[#allocation3 + $0x70] sm:$0xff] %vm1081_vm5, %v1014_v50 }
 0x263   : > { %2787 = vrcp.f32 %v2353_v55 }
 0x264   : > { %v855_v37 = vpop.permute.xlu1 %854 }
 0x265   : > { %920 = vst.msk [vmem:[#allocation3 + $0xf8] sm:$0xff] %vm888_vm4, %v855_v37  ;;  %v1592_v35 = vpop.permute.xlu0 %1591 }
 0x266   : > { %1675 = vst.msk [vmem:[#allocation3 + $0x68] sm:$0xff] %vm1661_vm8, %v1592_v35 }
 0x268   : > { %v1046_v9 = vpop.permute.xlu1 %1045 }
 0x269   : > { %1112 = vst.msk [vmem:[#allocation3 + $0xf0] sm:$0xff] %vm1081_vm5, %v1046_v9  ;;  %v2782_v41 = vpop.eup %2781  ;;  %v1783_v59 = vpop.permute.xlu0 %1782 }
 0x26a   : > { %v2784_v5 = vpop.eup %2783  ;;  %v2466_v49 = vmul.f32 %v2782_v41, %v2184_v31  ;;  %1867 = vst.msk [vmem:[#allocation3 + $0x60] sm:$0xff] %vm1854_vm9, %v1783_v59 }
 0x26b   : > { %v2465_v54 = vmul.f32 %v2784_v5, %v2179_v2 }
 0x26c   : > { %v2786_v8 = vpop.eup %2785  ;;  %v1624_v14 = vpop.permute.xlu1 %1623  ;;  %2498 = vst.msk [vmem:[%s3919_s17 + $0x88] sm:$0xff] %vm171_vm0, %v2466_v49 }
 0x26d   : > { %v2788_v51 = vpop.eup %2787  ;;  %v2450_v19 = vmul.f32 %v2786_v8, %v2104_v4  ;;  %1691 = vst.msk [vmem:[#allocation3 + $0xe8] sm:$0xff] %vm1661_vm8, %v1624_v14  ;;  %v1016_v63 = vpop.permute.xlu0 %1015 }
 0x26e   : > { %2497 = vst.msk [vmem:[%s3919_s17 + $0x80] sm:$0xff] %vm171_vm0, %v2465_v54  ;;  %v2449_v53 = vmul.f32 %v2788_v51, %v2099_v7 }
 0x26f   : > { %2482 = vst.msk [vmem:[%s3919_s17 + $0x8] sm:$0xff] %vm171_vm0, %v2450_v19 }
 0x270   : > { %1097 = vst.msk [vmem:[#allocation3 + $0x78] sm:$0xff] %vm1081_vm5, %v1016_v63  ;;  %v1815_v24 = vpop.permute.xlu1 %1814 }
 0x271   : > { %2481 = vst.msk [vmem:[%s3919_s17] sm:$0xff] %vm171_vm0, %v2449_v53  ;;  %v1207_v11 = vpop.permute.xlu0 %1206  ;;  %v1899_v26 = vld [vmem:[#allocation3 + $0x60] sm:$0xff] }
 0x272   : > { %1883 = vst.msk [vmem:[#allocation3 + $0xe0] sm:$0xff] %vm1854_vm9, %v1815_v24  ;;  %2712 = vmatprep.mubr.msk.f32.mxu0 %vm1931_vm10, %v1899_v26 }
 0x273   : > { %1289 = vst.msk [vmem:[#allocation3 + $0x70] sm:$0xff] %vm1274_vm6, %v1207_v11 }
 0x274   : > { %v1048_v44 = vpop.permute.xlu1 %1047 }
 0x275   : > { %1113 = vst.msk [vmem:[#allocation3 + $0xf8] sm:$0xff] %vm1081_vm5, %v1048_v44  ;;  %v1785_v23 = vpop.permute.xlu0 %1784  ;;  %v2699_v28 = vpop.f32.mrb[2].mxu0 }
 0x276   : > { %1868 = vst.msk [vmem:[#allocation3 + $0x68] sm:$0xff] %vm1854_vm9, %v1785_v23  ;;  %v2114_v46 = vadd.f32 %v2699_v28, %v3890_v12  ;;  %v2108_v47 = vpop.f32.mrb[3].mxu0 }
 0x277   : > { %v2109_v16 = vadd.f32 %v3890_v12, %v2108_v47 }
 0x278   : > { %v1239_v22 = vpop.permute.xlu1 %1238  ;;  %v2614_v60 = vmul.f32 -1.442695, %v2114_v46 }
 0x279   : > { %v1915_v58 = vld [vmem:[#allocation3 + $0xe0] sm:$0xff]  ;;  %1305 = vst.msk [vmem:[#allocation3 + $0xf0] sm:$0xff] %vm1274_vm6, %v1239_v22  ;;  %v2613_v20 = vmul.f32 -1.442695, %v2109_v16  ;;  %v1209_v18 = vpop.permute.xlu0 %1208 }
 0x27a   : > { %2736 = vmatprep.mubr.msk.f32.mxu1 %vm1931_vm10, %v1915_v58  ;;  %2789 = vpow2.f32 %v2614_v60  ;;  %1290 = vst.msk [vmem:[#allocation3 + $0x78] sm:$0xff] %vm1274_vm6, %v1209_v18 }
 0x27b   : > { %2791 = vpow2.f32 %v2613_v20 }
 0x27c   : > { %v2723_v62 = vpop.f32.mrb[2].mxu1  ;;  %v1817_v0 = vpop.permute.xlu1 %1816 }
 0x27d   : > { %v2194_v17 = vadd.f32 %v2723_v62, %v3890_v12  ;;  %1884 = vst.msk [vmem:[#allocation3 + $0xe8] sm:$0xff] %vm1854_vm9, %v1817_v0  ;;  %v2188_v1 = vpop.f32.mrb[3].mxu1  ;;  %v1401_v61 = vpop.permute.xlu0 %1400  ;;  %v1900_v2 = vld [vmem:[#allocation3 + $0x68] sm:$0xff] }
 0x27e   : > { %v2189_v31 = vadd.f32 %v3890_v12, %v2188_v1  ;;  %1483 = vst.msk [vmem:[#allocation3 + $0x70] sm:$0xff] %vm1468_vm7, %v1401_v61  ;;  %2713 = vmatmul.mubr.msk.f32.gmra.mrb[12].mxu0 %vm1931_vm10, %v1900_v2 }
 0x27f   : > { %v2630_v34 = vmul.f32 -1.442695, %v2194_v17 }
 0x280   : > { %v2629_v40 = vmul.f32 -1.442695, %v2189_v31  ;;  %v1241_v3 = vpop.permute.xlu1 %1240 }
 0x281   : > { %2793 = vpow2.f32 %v2630_v34  ;;  %1306 = vst.msk [vmem:[#allocation3 + $0xf8] sm:$0xff] %vm1274_vm6, %v1241_v3  ;;  %v1403_v4 = vpop.permute.xlu0 %1402 }
 0x282   : > { %2795 = vpow2.f32 %v2629_v40  ;;  %1484 = vst.msk [vmem:[#allocation3 + $0x78] sm:$0xff] %vm1468_vm7, %v1403_v4 }
 0x284   : > { %v1433_v39 = vpop.permute.xlu1 %1432  ;;  %v1916_v43 = vld [vmem:[#allocation3 + $0xe8] sm:$0xff]  ;;  %v2790_v7 = vpop.eup %2789 }
 0x285   : > { %1499 = vst.msk [vmem:[#allocation3 + $0xf0] sm:$0xff] %vm1468_vm7, %v1433_v39  ;;  %2737 = vmatmul.mubr.msk.f32.gmra.mrb[12].mxu1 %vm1931_vm10, %v1916_v43  ;;  %v2792_v52 = vpop.eup %2791  ;;  %v2356_v48 = vadd.f32 1.0, %v2790_v7  ;;  %v1594_v57 = vpop.permute.xlu0 %1593 }
 0x286   : > { %v2355_v6 = vadd.f32 1.0, %v2792_v52  ;;  %1676 = vst.msk [vmem:[#allocation3 + $0x70] sm:$0xff] %vm1661_vm8, %v1594_v57 }
 0x287   : > { %2797 = vrcp.f32 %v2356_v48 }
 0x288   : > { %v1435_v29 = vpop.permute.xlu1 %1434  ;;  %2799 = vrcp.f32 %v2355_v6 }
 0x289   : > { %1500 = vst.msk [vmem:[#allocation3 + $0xf8] sm:$0xff] %vm1468_vm7, %v1435_v29  ;;  %v1596_v30 = vpop.permute.xlu0 %1595 }
 0x28a   : > { %1677 = vst.msk [vmem:[#allocation3 + $0x78] sm:$0xff] %vm1661_vm8, %v1596_v30 }
 0x28b   : > { %v2794_v10 = vpop.eup %2793 }
 0x28c   : > { %v2796_v33 = vpop.eup %2795  ;;  %v2372_v15 = vadd.f32 1.0, %v2794_v10  ;;  %v1626_v25 = vpop.permute.xlu1 %1625 }
 0x28d   : > { %v2371_v56 = vadd.f32 1.0, %v2796_v33  ;;  %1692 = vst.msk [vmem:[#allocation3 + $0xf0] sm:$0xff] %vm1661_vm8, %v1626_v25  ;;  %v1787_v38 = vpop.permute.xlu0 %1786 }
 0x28e   : > { %2801 = vrcp.f32 %v2372_v15  ;;  %1869 = vst.msk [vmem:[#allocation3 + $0x70] sm:$0xff] %vm1854_vm9, %v1787_v38 }
 0x28f   : > { %2803 = vrcp.f32 %v2371_v56 }
 0x290   : > { %v1628_v13 = vpop.permute.xlu1 %1627 }
 0x291   : > { %1693 = vst.msk [vmem:[#allocation3 + $0xf8] sm:$0xff] %vm1661_vm8, %v1628_v13  ;;  %v2798_v42 = vpop.eup %2797  ;;  %v1789_v21 = vpop.permute.xlu0 %1788 }
 0x292   : > { %v2800_v27 = vpop.eup %2799  ;;  %v2452_v36 = vmul.f32 %v2798_v42, %v2114_v46  ;;  %1870 = vst.msk [vmem:[#allocation3 + $0x78] sm:$0xff] %vm1854_vm9, %v1789_v21 }
 0x293   : > { %v2451_v45 = vmul.f32 %v2800_v27, %v2109_v16 }
 0x294   : > { %v1819_v32 = vpop.permute.xlu1 %1818  ;;  %2484 = vst.msk [vmem:[%s3919_s17 + $0x18] sm:$0xff] %vm171_vm0, %v2452_v36 }
 0x295   : > { %1885 = vst.msk [vmem:[#allocation3 + $0xf0] sm:$0xff] %vm1854_vm9, %v1819_v32  ;;  %v1901_v55 = vld [vmem:[#allocation3 + $0x70] sm:$0xff] }
 0x296   : > { %2483 = vst.msk [vmem:[%s3919_s17 + $0x10] sm:$0xff] %vm171_vm0, %v2451_v45  ;;  %2715 = vmatprep.mubr.msk.f32.mxu0 %vm1931_vm10, %v1901_v55 }
 0x298   : > { %v2802_v50 = vpop.eup %2801  ;;  %v1821_v37 = vpop.permute.xlu1 %1820 }
 0x299   : > { %v2804_v35 = vpop.eup %2803  ;;  %v2468_v9 = vmul.f32 %v2802_v50, %v2194_v17  ;;  %1886 = vst.msk [vmem:[#allocation3 + $0xf8] sm:$0xff] %vm1854_vm9, %v1821_v37  ;;  %v1902_v59 = vld [vmem:[#allocation3 + $0x78] sm:$0xff] }
 0x29a   : > { %v2467_v41 = vmul.f32 %v2804_v35, %v2189_v31  ;;  %2716 = vmatmul.mubr.msk.f32.gmra.mrb[14].mxu0 %vm1931_vm10, %v1902_v59 }
 0x29b   : > { %2500 = vst.msk [vmem:[%s3919_s17 + $0x98] sm:$0xff] %vm171_vm0, %v2468_v9 }
 0x29c   : > { %2499 = vst.msk [vmem:[%s3919_s17 + $0x90] sm:$0xff] %vm171_vm0, %v2467_v41  ;;  %v1917_v5 = vld [vmem:[#allocation3 + $0xf0] sm:$0xff] }
 0x29d   : > { %2739 = vmatprep.mubr.msk.f32.mxu1 %vm1931_vm10, %v1917_v5 }
 0x2a0   : > { %v1918_v49 = vld [vmem:[#allocation3 + $0xf8] sm:$0xff] }
 0x2a1   : > { %2740 = vmatmul.mubr.msk.f32.gmra.mrb[14].mxu1 %vm1931_vm10, %v1918_v49  ;;  %v2702_v8 = vpop.f32.mrb[4].mxu0 }
 0x2a2   : > { %v2124_v54 = vadd.f32 %v2702_v8, %v3890_v12  ;;  %v2118_v14 = vpop.f32.mrb[5].mxu0 }
 0x2a3   : > { %v2119_v51 = vadd.f32 %v3890_v12, %v2118_v14 }
 0x2a4   : > { %v2616_v19 = vmul.f32 -1.442695, %v2124_v54 }
 0x2a5   : > { %v2615_v53 = vmul.f32 -1.442695, %v2119_v51 }
 0x2a6   : > { %2805 = vpow2.f32 %v2616_v19 }
 0x2a7   : > { %2807 = vpow2.f32 %v2615_v53 }
 0x2a8   : > { %v2726_v63 = vpop.f32.mrb[4].mxu1 }
 0x2a9   : > { %v2204_v24 = vadd.f32 %v2726_v63, %v3890_v12  ;;  %v2198_v11 = vpop.f32.mrb[5].mxu1 }
 0x2aa   : > { %v2199_v26 = vadd.f32 %v3890_v12, %v2198_v11 }
 0x2ab   : > { %v2632_v44 = vmul.f32 -1.442695, %v2204_v24 }
 0x2ac   : > { %v2631_v23 = vmul.f32 -1.442695, %v2199_v26 }
 0x2ad   : > { %2809 = vpow2.f32 %v2632_v44 }
 0x2ae   : > { %2811 = vpow2.f32 %v2631_v23 }
 0x2b0   : > { %v2806_v28 = vpop.eup %2805 }
 0x2b1   : > { %v2808_v46 = vpop.eup %2807  ;;  %v2358_v47 = vadd.f32 1.0, %v2806_v28 }
 0x2b2   : > { %v2357_v16 = vadd.f32 1.0, %v2808_v46 }
 0x2b3   : > { %2813 = vrcp.f32 %v2358_v47 }
 0x2b4   : > { %2815 = vrcp.f32 %v2357_v16 }
 0x2b7   : > { %v2810_v22 = vpop.eup %2809 }
 0x2b8   : > { %v2812_v58 = vpop.eup %2811  ;;  %v2374_v60 = vadd.f32 1.0, %v2810_v22 }
 0x2b9   : > { %v2373_v20 = vadd.f32 1.0, %v2812_v58 }
 0x2ba   : > { %2817 = vrcp.f32 %v2374_v60 }
 0x2bb   : > { %2819 = vrcp.f32 %v2373_v20 }
 0x2bd   : > { %v2814_v18 = vpop.eup %2813 }
 0x2be   : > { %v2816_v62 = vpop.eup %2815  ;;  %v2454_v0 = vmul.f32 %v2814_v18, %v2124_v54 }
 0x2bf   : > { %v2453_v17 = vmul.f32 %v2816_v62, %v2119_v51 }
 0x2c0   : > { %2486 = vst.msk [vmem:[%s3919_s17 + $0x28] sm:$0xff] %vm171_vm0, %v2454_v0 }
 0x2c1   : > { %2485 = vst.msk [vmem:[%s3919_s17 + $0x20] sm:$0xff] %vm171_vm0, %v2453_v17 }
 0x2c4   : > { %v2818_v1 = vpop.eup %2817 }
 0x2c5   : > { %v2820_v31 = vpop.eup %2819  ;;  %v2470_v61 = vmul.f32 %v2818_v1, %v2204_v24 }
 0x2c6   : > { %v2469_v2 = vmul.f32 %v2820_v31, %v2199_v26 }
 0x2c7   : > { %2502 = vst.msk [vmem:[%s3919_s17 + $0xa8] sm:$0xff] %vm171_vm0, %v2470_v61 }
 0x2c8   : > { %2501 = vst.msk [vmem:[%s3919_s17 + $0xa0] sm:$0xff] %vm171_vm0, %v2469_v2 }
 0x2cd   : > { %v2705_v34 = vpop.f32.mrb[6].mxu0 }
 0x2ce   : > { %v2134_v40 = vadd.f32 %v2705_v34, %v3890_v12  ;;  %v2128_v3 = vpop.f32.mrb[7].mxu0 }
 0x2cf   : > { %v2129_v4 = vadd.f32 %v3890_v12, %v2128_v3 }
 0x2d0   : > { %v2618_v39 = vmul.f32 -1.442695, %v2134_v40 }
 0x2d1   : > { %v2617_v43 = vmul.f32 -1.442695, %v2129_v4 }
 0x2d2   : > { %2821 = vpow2.f32 %v2618_v39 }
 0x2d3   : > { %2823 = vpow2.f32 %v2617_v43 }
 0x2d4   : > { %v2729_v7 = vpop.f32.mrb[6].mxu1 }
 0x2d5   : > { %v2214_v52 = vadd.f32 %v2729_v7, %v3890_v12  ;;  %v2208_v48 = vpop.f32.mrb[7].mxu1 }
 0x2d6   : > { %v2209_v57 = vadd.f32 %v3890_v12, %v2208_v48 }
 0x2d7   : > { %v2634_v6 = vmul.f32 -1.442695, %v2214_v52 }
 0x2d8   : > { %v2633_v29 = vmul.f32 -1.442695, %v2209_v57 }
 0x2d9   : > { %2825 = vpow2.f32 %v2634_v6 }
 0x2da   : > { %2827 = vpow2.f32 %v2633_v29 }
 0x2dc   : > { %v2822_v30 = vpop.eup %2821 }
 0x2dd   : > { %v2824_v10 = vpop.eup %2823  ;;  %v2360_v33 = vadd.f32 1.0, %v2822_v30 }
 0x2de   : > { %v2359_v15 = vadd.f32 1.0, %v2824_v10 }
 0x2df   : > { %2829 = vrcp.f32 %v2360_v33 }
 0x2e0   : > { %2831 = vrcp.f32 %v2359_v15 }
 0x2e3   : > { %v2826_v25 = vpop.eup %2825 }
 0x2e4   : > { %v2828_v56 = vpop.eup %2827  ;;  %v2376_v38 = vadd.f32 1.0, %v2826_v25 }
 0x2e5   : > { %v2375_v13 = vadd.f32 1.0, %v2828_v56 }
 0x2e6   : > { %2833 = vrcp.f32 %v2376_v38 }
 0x2e7   : > { %2835 = vrcp.f32 %v2375_v13 }
 0x2e9   : > { %v2830_v42 = vpop.eup %2829 }
 0x2ea   : > { %v2832_v21 = vpop.eup %2831  ;;  %v2456_v27 = vmul.f32 %v2830_v42, %v2134_v40 }
 0x2eb   : > { %v2455_v36 = vmul.f32 %v2832_v21, %v2129_v4 }
 0x2ec   : > { %2488 = vst.msk [vmem:[%s3919_s17 + $0x38] sm:$0xff] %vm171_vm0, %v2456_v27 }
 0x2ed   : > { %2487 = vst.msk [vmem:[%s3919_s17 + $0x30] sm:$0xff] %vm171_vm0, %v2455_v36 }
 0x2f0   : > { %v2834_v45 = vpop.eup %2833 }
 0x2f1   : > { %v2836_v32 = vpop.eup %2835  ;;  %v2472_v55 = vmul.f32 %v2834_v45, %v2214_v52 }
 0x2f2   : > { %v2471_v50 = vmul.f32 %v2836_v32, %v2209_v57 }
 0x2f3   : > { %2504 = vst.msk [vmem:[%s3919_s17 + $0xb8] sm:$0xff] %vm171_vm0, %v2472_v55 }
 0x2f4   : > { %2503 = vst.msk [vmem:[%s3919_s17 + $0xb0] sm:$0xff] %vm171_vm0, %v2471_v50 }
 0x2f9   : > { %v2708_v37 = vpop.f32.mrb[8].mxu0 }
 0x2fa   : > { %v2144_v35 = vadd.f32 %v2708_v37, %v3890_v12  ;;  %v2138_v9 = vpop.f32.mrb[9].mxu0 }
 0x2fb   : > { %v2139_v41 = vadd.f32 %v3890_v12, %v2138_v9 }
 0x2fc   : > { %v2620_v59 = vmul.f32 -1.442695, %v2144_v35 }
 0x2fd   : > { %v2619_v5 = vmul.f32 -1.442695, %v2139_v41 }
 0x2fe   : > { %2837 = vpow2.f32 %v2620_v59 }
 0x2ff   : > { %2839 = vpow2.f32 %v2619_v5 }
 0x300   : > { %v2732_v49 = vpop.f32.mrb[8].mxu1 }
 0x301   : > { %v2224_v8 = vadd.f32 %v2732_v49, %v3890_v12  ;;  %v2218_v54 = vpop.f32.mrb[9].mxu1 }
 0x302   : > { %v2219_v14 = vadd.f32 %v3890_v12, %v2218_v54 }
 0x303   : > { %v2636_v51 = vmul.f32 -1.442695, %v2224_v8 }
 0x304   : > { %v2635_v19 = vmul.f32 -1.442695, %v2219_v14 }
 0x305   : > { %2841 = vpow2.f32 %v2636_v51 }
 0x306   : > { %2843 = vpow2.f32 %v2635_v19 }
 0x308   : > { %v2838_v53 = vpop.eup %2837 }
 0x309   : > { %v2840_v63 = vpop.eup %2839  ;;  %v2362_v24 = vadd.f32 1.0, %v2838_v53 }
 0x30a   : > { %v2361_v11 = vadd.f32 1.0, %v2840_v63 }
 0x30b   : > { %2845 = vrcp.f32 %v2362_v24 }
 0x30c   : > { %2847 = vrcp.f32 %v2361_v11 }
 0x30f   : > { %v2842_v26 = vpop.eup %2841 }
 0x310   : > { %v2844_v44 = vpop.eup %2843  ;;  %v2378_v23 = vadd.f32 1.0, %v2842_v26 }
 0x311   : > { %v2377_v28 = vadd.f32 1.0, %v2844_v44 }
 0x312   : > { %2849 = vrcp.f32 %v2378_v23 }
 0x313   : > { %2851 = vrcp.f32 %v2377_v28 }
 0x315   : > { %v2846_v46 = vpop.eup %2845 }
 0x316   : > { %v2848_v47 = vpop.eup %2847  ;;  %v2458_v16 = vmul.f32 %v2846_v46, %v2144_v35 }
 0x317   : > { %v2457_v22 = vmul.f32 %v2848_v47, %v2139_v41 }
 0x318   : > { %2490 = vst.msk [vmem:[%s3919_s17 + $0x48] sm:$0xff] %vm171_vm0, %v2458_v16 }
 0x319   : > { %2489 = vst.msk [vmem:[%s3919_s17 + $0x40] sm:$0xff] %vm171_vm0, %v2457_v22 }
 0x31c   : > { %v2850_v58 = vpop.eup %2849 }
 0x31d   : > { %v2852_v60 = vpop.eup %2851  ;;  %v2474_v20 = vmul.f32 %v2850_v58, %v2224_v8 }
 0x31e   : > { %v2473_v18 = vmul.f32 %v2852_v60, %v2219_v14 }
 0x31f   : > { %2506 = vst.msk [vmem:[%s3919_s17 + $0xc8] sm:$0xff] %vm171_vm0, %v2474_v20 }
 0x320   : > { %2505 = vst.msk [vmem:[%s3919_s17 + $0xc0] sm:$0xff] %vm171_vm0, %v2473_v18 }
 0x325   : > { %v2711_v62 = vpop.f32.mrb[10].mxu0 }
 0x326   : > { %v2154_v0 = vadd.f32 %v2711_v62, %v3890_v12  ;;  %v2148_v17 = vpop.f32.mrb[11].mxu0 }
 0x327   : > { %v2149_v1 = vadd.f32 %v3890_v12, %v2148_v17 }
 0x328   : > { %v2622_v31 = vmul.f32 -1.442695, %v2154_v0 }
 0x329   : > { %v2621_v61 = vmul.f32 -1.442695, %v2149_v1 }
 0x32a   : > { %2853 = vpow2.f32 %v2622_v31 }
 0x32b   : > { %2855 = vpow2.f32 %v2621_v61 }
 0x32c   : > { %v2735_v2 = vpop.f32.mrb[10].mxu1 }
 0x32d   : > { %v2234_v34 = vadd.f32 %v2735_v2, %v3890_v12  ;;  %v2228_v40 = vpop.f32.mrb[11].mxu1 }
 0x32e   : > { %v2229_v3 = vadd.f32 %v3890_v12, %v2228_v40 }
 0x32f   : > { %v2638_v4 = vmul.f32 -1.442695, %v2234_v34 }
 0x330   : > { %v2637_v39 = vmul.f32 -1.442695, %v2229_v3 }
 0x331   : > { %2857 = vpow2.f32 %v2638_v4 }
 0x332   : > { %2859 = vpow2.f32 %v2637_v39 }
 0x334   : > { %v2854_v43 = vpop.eup %2853 }
 0x335   : > { %v2856_v7 = vpop.eup %2855  ;;  %v2364_v52 = vadd.f32 1.0, %v2854_v43 }
 0x336   : > { %v2363_v48 = vadd.f32 1.0, %v2856_v7 }
 0x337   : > { %2861 = vrcp.f32 %v2364_v52 }
 0x338   : > { %2863 = vrcp.f32 %v2363_v48 }
 0x33b   : > { %v2858_v57 = vpop.eup %2857 }
 0x33c   : > { %v2860_v6 = vpop.eup %2859  ;;  %v2380_v29 = vadd.f32 1.0, %v2858_v57 }
 0x33d   : > { %v2379_v30 = vadd.f32 1.0, %v2860_v6 }
 0x33e   : > { %2865 = vrcp.f32 %v2380_v29 }
 0x33f   : > { %2867 = vrcp.f32 %v2379_v30 }
 0x341   : > { %v2862_v10 = vpop.eup %2861 }
 0x342   : > { %v2864_v33 = vpop.eup %2863  ;;  %v2460_v15 = vmul.f32 %v2862_v10, %v2154_v0 }
 0x343   : > { %v2459_v25 = vmul.f32 %v2864_v33, %v2149_v1 }
 0x344   : > { %2492 = vst.msk [vmem:[%s3919_s17 + $0x58] sm:$0xff] %vm171_vm0, %v2460_v15 }
 0x345   : > { %2491 = vst.msk [vmem:[%s3919_s17 + $0x50] sm:$0xff] %vm171_vm0, %v2459_v25 }
 0x348   : > { %v2866_v56 = vpop.eup %2865 }
 0x349   : > { %v2868_v38 = vpop.eup %2867  ;;  %v2476_v13 = vmul.f32 %v2866_v56, %v2234_v34 }
 0x34a   : > { %v2475_v42 = vmul.f32 %v2868_v38, %v2229_v3 }
 0x34b   : > { %2508 = vst.msk [vmem:[%s3919_s17 + $0xd8] sm:$0xff] %vm171_vm0, %v2476_v13 }
 0x34c   : > { %2507 = vst.msk [vmem:[%s3919_s17 + $0xd0] sm:$0xff] %vm171_vm0, %v2475_v42 }
 0x351   : > { %v2714_v21 = vpop.f32.mrb[12].mxu0 }
 0x352   : > { %v2164_v27 = vadd.f32 %v2714_v21, %v3890_v12  ;;  %v2158_v36 = vpop.f32.mrb[13].mxu0 }
 0x353   : > { %v2159_v45 = vadd.f32 %v3890_v12, %v2158_v36 }
 0x354   : > { %v2624_v32 = vmul.f32 -1.442695, %v2164_v27 }
 0x355   : > { %v2623_v55 = vmul.f32 -1.442695, %v2159_v45 }
 0x356   : > { %2869 = vpow2.f32 %v2624_v32 }
 0x357   : > { %2871 = vpow2.f32 %v2623_v55 }
 0x358   : > { %v2738_v50 = vpop.f32.mrb[12].mxu1 }
 0x359   : > { %v2244_v37 = vadd.f32 %v2738_v50, %v3890_v12  ;;  %v2238_v35 = vpop.f32.mrb[13].mxu1 }
 0x35a   : > { %v2239_v9 = vadd.f32 %v3890_v12, %v2238_v35 }
 0x35b   : > { %v2640_v41 = vmul.f32 -1.442695, %v2244_v37 }
 0x35c   : > { %v2639_v59 = vmul.f32 -1.442695, %v2239_v9 }
 0x35d   : > { %2873 = vpow2.f32 %v2640_v41 }
 0x35e   : > { %2875 = vpow2.f32 %v2639_v59 }
 0x360   : > { %v2870_v5 = vpop.eup %2869 }
 0x361   : > { %v2872_v49 = vpop.eup %2871  ;;  %v2366_v8 = vadd.f32 1.0, %v2870_v5 }
 0x362   : > { %v2365_v54 = vadd.f32 1.0, %v2872_v49 }
 0x363   : > { %2877 = vrcp.f32 %v2366_v8 }
 0x364   : > { %2879 = vrcp.f32 %v2365_v54 }
 0x367   : > { %v2874_v14 = vpop.eup %2873 }
 0x368   : > { %v2876_v51 = vpop.eup %2875  ;;  %v2382_v19 = vadd.f32 1.0, %v2874_v14 }
 0x369   : > { %v2381_v53 = vadd.f32 1.0, %v2876_v51 }
 0x36a   : > { %2881 = vrcp.f32 %v2382_v19 }
 0x36b   : > { %2883 = vrcp.f32 %v2381_v53 }
 0x36d   : > { %v2878_v63 = vpop.eup %2877  ;;  %v2717_v24 = vpop.f32.mrb[14].mxu0 }
 0x36e   : > { %v2880_v11 = vpop.eup %2879  ;;  %v2462_v26 = vmul.f32 %v2878_v63, %v2164_v27  ;;  %v2174_v44 = vadd.f32 %v2717_v24, %v3890_v12  ;;  %v2168_v23 = vpop.f32.mrb[15].mxu0 }
 0x36f   : > { %v2461_v28 = vmul.f32 %v2880_v11, %v2159_v45  ;;  %v2169_v46 = vadd.f32 %v3890_v12, %v2168_v23 }
 0x370   : > { %2494 = vst.msk [vmem:[%s3919_s17 + $0x68] sm:$0xff] %vm171_vm0, %v2462_v26  ;;  %v2626_v47 = vmul.f32 -1.442695, %v2174_v44 }
 0x371   : > { %2493 = vst.msk [vmem:[%s3919_s17 + $0x60] sm:$0xff] %vm171_vm0, %v2461_v28  ;;  %v2625_v16 = vmul.f32 -1.442695, %v2169_v46 }
 0x372   : > { %2885 = vpow2.f32 %v2626_v47 }
 0x373   : > { %2887 = vpow2.f32 %v2625_v16 }
 0x374   : > { %v2882_v22 = vpop.eup %2881  ;;  %v2741_v58 = vpop.f32.mrb[14].mxu1 }
 0x375   : > { %v2884_v60 = vpop.eup %2883  ;;  %v2478_v20 = vmul.f32 %v2882_v22, %v2244_v37  ;;  %v2254_v18 = vadd.f32 %v2741_v58, %v3890_v12  ;;  %v2248_v62 = vpop.f32.mrb[15].mxu1 }
 0x376   : > { %v2477_v0 = vmul.f32 %v2884_v60, %v2239_v9  ;;  %v2249_v17 = vadd.f32 %v3890_v12, %v2248_v62 }
 0x377   : > { %2510 = vst.msk [vmem:[%s3919_s17 + $0xe8] sm:$0xff] %vm171_vm0, %v2478_v20  ;;  %v2642_v1 = vmul.f32 -1.442695, %v2254_v18 }
 0x378   : > { %2509 = vst.msk [vmem:[%s3919_s17 + $0xe0] sm:$0xff] %vm171_vm0, %v2477_v0  ;;  %v2641_v31 = vmul.f32 -1.442695, %v2249_v17 }
 0x379   : > { %2889 = vpow2.f32 %v2642_v1 }
 0x37a   : > { %2891 = vpow2.f32 %v2641_v31 }
 0x37c   : > { %v2886_v61 = vpop.eup %2885 }
 0x37d   : > { %v2888_v2 = vpop.eup %2887  ;;  %v2368_v34 = vadd.f32 1.0, %v2886_v61 }
 0x37e   : > { %v2367_v40 = vadd.f32 1.0, %v2888_v2 }
 0x37f   : > { %2893 = vrcp.f32 %v2368_v34 }
 0x380   : > { %2895 = vrcp.f32 %v2367_v40 }
 0x383   : > { %v2890_v3 = vpop.eup %2889 }
 0x384   : > { %v2892_v4 = vpop.eup %2891  ;;  %v2384_v12 = vadd.f32 1.0, %v2890_v3 }
 0x385   : > { %v2383_v39 = vadd.f32 1.0, %v2892_v4 }
 0x386   : > { %2897 = vrcp.f32 %v2384_v12 }
 0x387   : > { %2899 = vrcp.f32 %v2383_v39 }
 0x389   : > { %v2894_v43 = vpop.eup %2893 }
 0x38a   : > { %v2896_v7 = vpop.eup %2895  ;;  %v2464_v52 = vmul.f32 %v2894_v43, %v2174_v44 }
 0x38b   : > { %v2463_v48 = vmul.f32 %v2896_v7, %v2169_v46 }
 0x38c   : > { %2496 = vst.msk [vmem:[%s3919_s17 + $0x78] sm:$0xff] %vm171_vm0, %v2464_v52 }
 0x38d   : > { %2495 = vst.msk [vmem:[%s3919_s17 + $0x70] sm:$0xff] %vm171_vm0, %v2463_v48 }
 0x390   : > { %v2898_v57 = vpop.eup %2897 }
 0x391   : > { %v2900_v6 = vpop.eup %2899  ;;  %v2480_v29 = vmul.f32 %v2898_v57, %v2254_v18 }
 0x392   : > { %v2479_v30 = vmul.f32 %v2900_v6, %v2249_v17 }
 0x393   : > { %2512 = vst.msk [vmem:[%s3919_s17 + $0xf8] sm:$0xff] %vm171_vm0, %v2480_v29 }
 0x394   : > { %2511 = vst.msk [vmem:[%s3919_s17 + $0xf0] sm:$0xff] %vm171_vm0, %v2479_v30 }
 0x395 PF: > { %s13_s12 = sadd.s32 1, %s2907_s12  }
 0x396   : > { %p10_p4 = scmp.ge.s32.totalorder %s13_s12, 4  }
 0x398   :  { %12 = sbr.rel (!%p10_p4) target bundleno = 1 (0x1), region = 65 }

</bundles_post_ra>
